<compile_context>
chip_gen: v5e
topology: v5e:2x2
jax: 0.10.0
libtpu: 0.0.40
codegen_flags: <defaults>
</compile_context>

<pallas_src>
import functools
import math

import numpy as np
import jax
import jax.numpy as jnp
from jax import lax
from jax.experimental import pallas as pl
from jax.experimental.pallas import tpu as pltpu


def _efficient_attention_kernel(
    # inputs
    x_ref,       # (1, C, HW)  f32   one batch element, channel-major (resident across q tiles)
    gproj_ref,   # (C, C)      f32   group-membership projector (block diagonal of ones)
    gamma_ref,   # (C, 1)      f32   GroupNorm scale
    beta_ref,    # (C, 1)      f32   GroupNorm shift
    wqkv_ref,    # (3C, C)     bf16  fused qkv weight (softmax scale folded into q rows)
    bqkv_ref,    # (3C, 1)     f32   fused qkv bias   (softmax scale folded into q rows)
    wp_ref,      # (C, C)      bf16  output projection weight
    bp_ref,      # (C, 1)      f32   output projection bias
    # output
    o_ref,       # (1, C, TQ)  f32   output tile for query block `qi`
    # scratch (persists across the query-tile grid axis)
    q_s, k_s, v_s,               # (C, HW) bf16 each
    *, C, HW, TQ, TK, n_kv, eps, inv_group_elems,
):
    qi = pl.program_id(1)

    # ---------- phase 1 (once per batch element, at qi == 0):
    #            GroupNorm stats (sum-then-project) + fused bf16 QKV into VMEM scratch
    @pl.when(qi == 0)
    def _prep():
        # per-channel sums over the spatial (lane) axis, accumulated chunk-wise (f32)
        s1 = jnp.zeros((C, 1), jnp.float32)
        s2 = jnp.zeros((C, 1), jnp.float32)
        for j in range(n_kv):
            xc = x_ref[0, :, j * TK:(j + 1) * TK]                      # (C, TK) f32
            s1 = s1 + jnp.sum(xc, axis=1, keepdims=True)
            s2 = s2 + jnp.sum(xc * xc, axis=1, keepdims=True)
        # spread per-channel sums within each group: tiny (C,C)x(C,1) matmul
        g1 = jnp.dot(gproj_ref[...], s1, preferred_element_type=jnp.float32)
        g2 = jnp.dot(gproj_ref[...], s2, preferred_element_type=jnp.float32)
        mean = g1 * inv_group_elems
        var = jnp.maximum(g2 * inv_group_elems - mean * mean, 0.0)     # clamp: no NaNs
        rstd = lax.rsqrt(var + eps)
        scale_c = gamma_ref[...] * rstd                                # (C, 1)
        shift_c = beta_ref[...] - mean * scale_c                       # (C, 1)

        wqkv = wqkv_ref[...]                                           # (3C, C) bf16
        bqkv = bqkv_ref[...]                                           # (3C, 1) f32
        for j in range(n_kv):
            xc = x_ref[0, :, j * TK:(j + 1) * TK]                      # (C, TK) f32
            hc = (xc * scale_c + shift_c).astype(jnp.bfloat16)         # GroupNorm'd, bf16
            qkvc = (jnp.dot(wqkv, hc, preferred_element_type=jnp.float32)
                    + bqkv).astype(jnp.bfloat16)                       # (3C, TK)
            q_s[:, j * TK:(j + 1) * TK] = qkvc[:C]
            k_s[:, j * TK:(j + 1) * TK] = qkvc[C:2 * C]
            v_s[:, j * TK:(j + 1) * TK] = qkvc[2 * C:]

    # ---------- phase 2: flash attention for query tile qi (online softmax over KV tiles)
    q0 = pl.multiple_of(qi * TQ, TQ)
    q_blk = q_s[:, pl.ds(q0, TQ)]                                      # (C, TQ) bf16

    m = jnp.full((1, TQ), -1e30, jnp.float32)
    l = jnp.zeros((1, TQ), jnp.float32)
    acc = jnp.zeros((C, TQ), jnp.float32)
    for j in range(n_kv):
        k_blk = k_s[:, j * TK:(j + 1) * TK]                            # (C, TK) bf16
        v_blk = v_s[:, j * TK:(j + 1) * TK]                            # (C, TK) bf16
        # s_t[m, n] = sum_c k[c, m] * q[c, n]   (softmax scale already folded into q)
        s_t = lax.dot_general(k_blk, q_blk, (((0,), (0,)), ((), ())),
                              preferred_element_type=jnp.float32)      # (TK, TQ) f32
        m_new = jnp.maximum(m, jnp.max(s_t, axis=0, keepdims=True))    # (1, TQ)
        alpha = jnp.exp(m - m_new)                                     # (1, TQ)
        # NOTE(v6e/v7x): exp could be done in bf16 if the single EUP becomes the binder.
        p = jnp.exp(s_t - m_new)                                       # (TK, TQ) f32
        l = alpha * l + jnp.sum(p, axis=0, keepdims=True)
        acc = alpha * acc + jnp.dot(v_blk, p.astype(jnp.bfloat16),
                                    preferred_element_type=jnp.float32)  # (C, TQ)
        m = m_new

    inv_l = pl.reciprocal(l, approx=True)                              # EUP, ~free slot
    out_b = (acc * inv_l).astype(jnp.bfloat16)                         # (C, TQ)
    proj = jnp.dot(wp_ref[...], out_b,
                   preferred_element_type=jnp.float32) + bp_ref[...]   # (C, TQ) f32
    o_ref[0] = x_ref[0, :, pl.ds(q0, TQ)] + proj                       # residual, lane-dense store


def _pick_tile(n):
    for t in (512, 256, 128):
        if n % t == 0:
            return t
    return n


def efficient_attention(x_nchw, params):
    """x_nchw: (B, C, H, W) float32.  Returns (B, C, H, W) float32."""
    B, C, H, W = x_nchw.shape
    HW = H * W
    if HW > 4096:                                  # same early-exit as the PyTorch module
        return x_nchw

    G = 8
    assert C % G == 0

    # NCHW is already channel-major: collapsing spatial dims is a free reshape (no transpose).
    x_cm = x_nchw.reshape(B, C, HW).astype(jnp.float32)

    TQ = _pick_tile(HW)
    TK = _pick_tile(HW)
    n_q = HW // TQ
    n_kv = HW // TK

    scale = float(C) ** (-0.5)

    # group-membership projector: P[c, c'] = 1 iff c, c' in the same GroupNorm group
    gid = jnp.arange(C) // (C // G)
    gproj = (gid[:, None] == gid[None, :]).astype(jnp.float32)             # (C, C)

    gamma = params["gn_gamma"].astype(jnp.float32).reshape(C, 1)
    beta = params["gn_beta"].astype(jnp.float32).reshape(C, 1)

    # fused qkv weight/bias; fold softmax scale into the q rows (removes O(HW^2) multiply)
    w_qkv = params["w_qkv"].astype(jnp.float32)                            # (3C, C)
    b_qkv = params["b_qkv"].astype(jnp.float32)                            # (3C,)
    row_scale = jnp.concatenate(
        [jnp.full((C,), scale, jnp.float32), jnp.ones((2 * C,), jnp.float32)])
    wqkv_b = (w_qkv * row_scale[:, None]).astype(jnp.bfloat16)             # (3C, C) bf16
    bqkv = (b_qkv * row_scale).reshape(3 * C, 1)                           # (3C, 1) f32

    wp_b = params["w_proj"].astype(jnp.bfloat16)                           # (C, C) bf16
    bp = params["b_proj"].astype(jnp.float32).reshape(C, 1)                # (C, 1) f32

    kernel = functools.partial(
        _efficient_attention_kernel,
        C=C, HW=HW, TQ=TQ, TK=TK, n_kv=n_kv,
        eps=1e-5, inv_group_elems=1.0 / float(HW * (C // G)))

    def const(*shape):
        return pl.BlockSpec(shape, lambda b, q: (0,) * len(shape))
    # TODO(synk): for large C, mark the constant weight specs pipeline_mode=pl.Buffered(1)
    # so operands whose block index never changes are not double-buffered.

    # explicit VMEM budget (do not rely on default scoped limits); conservative estimate + cap
    vmem_est = (
        2 * C * HW * 4                       # x block, double-buffered
        + 2 * C * TQ * 4                     # output block, double-buffered
        + 3 * C * HW * 2                     # q/k/v bf16 scratch
        + 2 * (C * C * 4 + 3 * C * C * 2 + C * C * 2 + 16 * C * 4)   # weights/params
        + 3 * C * TK * 4 + 3 * TK * TQ * 4 + 4 * C * TQ * 4          # transients
    )
    vmem_limit = int(min(64 * 1024 * 1024, max(16 * 1024 * 1024, 2 * vmem_est)))

    flops = int(B * (2 * 3 * C * C * HW      # fused qkv matmul
                     + 4 * HW * HW * C       # k^T q  and  v @ p
                     + 2 * C * C * HW        # output projection
                     + 12 * C * HW))         # groupnorm / softmax elementwise
    transcendentals = int(B * (HW * HW + 2 * n_q * (n_kv + 1) * TQ + 2 * C))
    bytes_accessed = int(B * C * HW * 4 * 2
                         + C * C * 4 + 3 * C * C * 2 + C * C * 2 + 16 * C * 4)

    out_cm = pl.pallas_call(
        kernel,
        out_shape=jax.ShapeDtypeStruct((B, C, HW), jnp.float32),
        grid=(B, n_q),
        in_specs=[
            pl.BlockSpec((1, C, HW), lambda b, q: (b, 0, 0)),   # x, resident per batch element
            const(C, C),                                        # group projector
            const(C, 1), const(C, 1),                           # gamma, beta
            const(3 * C, C), const(3 * C, 1),                   # fused Wqkv, bqkv
            const(C, C), const(C, 1),                           # Wproj, bproj
        ],
        out_specs=pl.BlockSpec((1, C, TQ), lambda b, q: (b, 0, q)),
        scratch_shapes=[pltpu.VMEM((C, HW), jnp.bfloat16)] * 3,
        compiler_params=pltpu.CompilerParams(
            dimension_semantics=("parallel", "arbitrary"),
            vmem_limit_bytes=vmem_limit),
        cost_estimate=pl.CostEstimate(
            flops=flops, transcendentals=transcendentals,
            bytes_accessed=bytes_accessed),
    )(x_cm, gproj, gamma, beta, wqkv_b, bqkv, wp_b, bp)

    return out_cm.reshape(B, C, H, W)


def reference_efficient_attention(x, params):
    """Pure-JAX mirror of the PyTorch forward (NCHW), for validation."""
    B, C, H, W = x.shape
    G = 8
    gamma = params["gn_gamma"]
    beta = params["gn_beta"]
    w_qkv, b_qkv = params["w_qkv"], params["b_qkv"]
    w_proj, b_proj = params["w_proj"], params["b_proj"]

    xg = x.reshape(B, G, C // G, H, W)
    mean = xg.mean(axis=(2, 3, 4), keepdims=True)
    var = xg.var(axis=(2, 3, 4), keepdims=True)
    hn = (xg - mean) / jnp.sqrt(var + 1e-5)
    hn = hn.reshape(B, C, H, W) * gamma.reshape(1, C, 1, 1) + beta.reshape(1, C, 1, 1)

    hflat = hn.reshape(B, C, H * W)
    qkv = jnp.einsum("oc,bcn->bon", w_qkv, hflat) + b_qkv.reshape(1, -1, 1)  # (B, 3C, HW)
    q, k, v = qkv[:, :C], qkv[:, C:2 * C], qkv[:, 2 * C:]
    attn = jax.nn.softmax(
        jnp.einsum("bcn,bcm->bnm", q, k) * (float(C) ** -0.5), axis=-1)      # (B, HW, HW)
    h = jnp.einsum("bcm,bnm->bcn", v, attn).reshape(B, C, H, W)              # v @ attn^T
    proj = jnp.einsum("oc,bchw->bohw", w_proj, h) + b_proj.reshape(1, C, 1, 1)
    return x + proj


if __name__ == "__main__":
    B, C, H, W = 2, 32, 16, 16

    key = jax.random.PRNGKey(0)
    keys = jax.random.split(key, 7)
    params = {
        "gn_gamma": 1.0 + 0.1 * jax.random.normal(keys[0], (C,), jnp.float32),
        "gn_beta": 0.1 * jax.random.normal(keys[1], (C,), jnp.float32),
        "w_qkv": jax.random.normal(keys[2], (3 * C, C), jnp.float32) / math.sqrt(C),
        "b_qkv": 0.05 * jax.random.normal(keys[3], (3 * C,), jnp.float32),
        "w_proj": jax.random.normal(keys[4], (C, C), jnp.float32) / math.sqrt(C),
        "b_proj": 0.05 * jax.random.normal(keys[5], (C,), jnp.float32),
    }
    x = jax.random.normal(keys[6], (B, C, H, W), jnp.float32)

    out = efficient_attention(x, params)
    out = jax.block_until_ready(out)

    ref = jax.block_until_ready(reference_efficient_attention(x, params))
    np.testing.assert_allclose(np.asarray(out), np.asarray(ref), rtol=1e-2, atol=1e-2)

    print("KERNEL_OK")
</pallas_src>

<mosaic_0001>
module attributes {stable_mosaic.version = 11 : i64} {
  func.func @_efficient_attention_kernel(%arg0: i32, %arg1: i32, %arg2: memref<1x32x256xf32, #tpu.memory_space<vmem>>, %arg3: memref<32x32xf32, #tpu.memory_space<vmem>>, %arg4: memref<32x1xf32, #tpu.memory_space<vmem>>, %arg5: memref<32x1xf32, #tpu.memory_space<vmem>>, %arg6: memref<96x32xbf16, #tpu.memory_space<vmem>>, %arg7: memref<96x1xf32, #tpu.memory_space<vmem>>, %arg8: memref<32x32xbf16, #tpu.memory_space<vmem>>, %arg9: memref<32x1xf32, #tpu.memory_space<vmem>>, %arg10: memref<1x32x256xf32, #tpu.memory_space<vmem>>, %arg11: memref<32x256xbf16, #tpu.memory_space<vmem>>, %arg12: memref<32x256xbf16, #tpu.memory_space<vmem>>, %arg13: memref<32x256xbf16, #tpu.memory_space<vmem>>) attributes {dimension_semantics = [#tpu.dimension_semantics<parallel>, #tpu.dimension_semantics<arbitrary>], iteration_bounds = array<i64: 2, 1>, scalar_prefetch = 0 : i64, scratch_operands = 3 : i64, tpu.core_type = #tpu.core_type<tc>, window_params = [{transform_indices = @transform_0, window_bounds = array<i64: 1, 32, 256>}, {pipeline_mode = #tpu.pipeline_mode<synchronous>, transform_indices = @transform_1, window_bounds = array<i64: 32, 32>}, {pipeline_mode = #tpu.pipeline_mode<synchronous>, transform_indices = @transform_2, window_bounds = array<i64: 32, 1>}, {pipeline_mode = #tpu.pipeline_mode<synchronous>, transform_indices = @transform_3, window_bounds = array<i64: 32, 1>}, {pipeline_mode = #tpu.pipeline_mode<synchronous>, transform_indices = @transform_4, window_bounds = array<i64: 96, 32>}, {pipeline_mode = #tpu.pipeline_mode<synchronous>, transform_indices = @transform_5, window_bounds = array<i64: 96, 1>}, {pipeline_mode = #tpu.pipeline_mode<synchronous>, transform_indices = @transform_6, window_bounds = array<i64: 32, 32>}, {pipeline_mode = #tpu.pipeline_mode<synchronous>, transform_indices = @transform_7, window_bounds = array<i64: 32, 1>}, {transform_indices = @transform_8, window_bounds = array<i64: 1, 32, 256>}]} {
    %c0_i32 = arith.constant 0 : i32
    %0 = arith.cmpi eq, %arg1, %c0_i32 : i32
    %1 = arith.extui %0 : i1 to i32
    %c0_i32_0 = arith.constant 0 : i32
    %2 = arith.cmpi ne, %1, %c0_i32_0 : i32
    scf.if %2 {
      %cst_21 = arith.constant 0.000000e+00 : f32
      %46 = vector.broadcast %cst_21 : f32 to vector<32x1xf32>
      %cst_22 = arith.constant 0.000000e+00 : f32
      %47 = vector.broadcast %cst_22 : f32 to vector<32x1xf32>
      %c0_23 = arith.constant 0 : index
      %c0_24 = arith.constant 0 : index
      %c0_25 = arith.constant 0 : index
      %48 = vector.load %arg2[%c0_23, %c0_24, %c0_25] : memref<1x32x256xf32, #tpu.memory_space<vmem>>, vector<1x32x256xf32>
      %49 = vector.shape_cast %48 : vector<1x32x256xf32> to vector<32x256xf32>
      %cst_26 = arith.constant dense<0.000000e+00> : vector<32xf32>
      %50 = vector.multi_reduction <add>, %49, %cst_26 [1] : vector<32x256xf32> to vector<32xf32>
      %51 = vector.shape_cast %50 : vector<32xf32> to vector<32x1xf32>
      %52 = arith.addf %46, %51 : vector<32x1xf32>
      %53 = arith.mulf %49, %49 : vector<32x256xf32>
      %cst_27 = arith.constant dense<0.000000e+00> : vector<32xf32>
      %54 = vector.multi_reduction <add>, %53, %cst_27 [1] : vector<32x256xf32> to vector<32xf32>
      %55 = vector.shape_cast %54 : vector<32xf32> to vector<32x1xf32>
      %56 = arith.addf %47, %55 : vector<32x1xf32>
      %c0_28 = arith.constant 0 : index
      %c0_29 = arith.constant 0 : index
      %57 = vector.load %arg3[%c0_28, %c0_29] : memref<32x32xf32, #tpu.memory_space<vmem>>, vector<32x32xf32>
      %cst_30 = arith.constant dense<0.000000e+00> : vector<32x1xf32>
      %58 = tpu.matmul %57, %52, %cst_30 {dimension_numbers = #tpu.dot_dimension_numbers<[1], [0], [0], [1], [0, 0, 1, 1], [], []>} : vector<32x32xf32>, vector<32x1xf32>, vector<32x1xf32> -> vector<32x1xf32>
      %c0_31 = arith.constant 0 : index
      %c0_32 = arith.constant 0 : index
      %59 = vector.load %arg3[%c0_31, %c0_32] : memref<32x32xf32, #tpu.memory_space<vmem>>, vector<32x32xf32>
      %cst_33 = arith.constant dense<0.000000e+00> : vector<32x1xf32>
      %60 = tpu.matmul %59, %56, %cst_33 {dimension_numbers = #tpu.dot_dimension_numbers<[1], [0], [0], [1], [0, 0, 1, 1], [], []>} : vector<32x32xf32>, vector<32x1xf32>, vector<32x1xf32> -> vector<32x1xf32>
      %cst_34 = arith.constant 9.765625E-4 : f32
      %61 = vector.broadcast %cst_34 : f32 to vector<32x1xf32>
      %62 = arith.mulf %58, %61 : vector<32x1xf32>
      %cst_35 = arith.constant 9.765625E-4 : f32
      %63 = vector.broadcast %cst_35 : f32 to vector<32x1xf32>
      %64 = arith.mulf %60, %63 : vector<32x1xf32>
      %65 = arith.mulf %62, %62 : vector<32x1xf32>
      %66 = arith.subf %64, %65 : vector<32x1xf32>
      %cst_36 = arith.constant 0.000000e+00 : f32
      %67 = vector.broadcast %cst_36 : f32 to vector<32x1xf32>
      %68 = arith.maximumf %66, %67 : vector<32x1xf32>
      %cst_37 = arith.constant 9.99999974E-6 : f32
      %69 = vector.broadcast %cst_37 : f32 to vector<32x1xf32>
      %70 = arith.addf %68, %69 : vector<32x1xf32>
      %71 = math.rsqrt %70 : vector<32x1xf32>
      %c0_38 = arith.constant 0 : index
      %c0_39 = arith.constant 0 : index
      %72 = vector.load %arg4[%c0_38, %c0_39] : memref<32x1xf32, #tpu.memory_space<vmem>>, vector<32x1xf32>
      %73 = arith.mulf %72, %71 : vector<32x1xf32>
      %c0_40 = arith.constant 0 : index
      %c0_41 = arith.constant 0 : index
      %74 = vector.load %arg5[%c0_40, %c0_41] : memref<32x1xf32, #tpu.memory_space<vmem>>, vector<32x1xf32>
      %75 = arith.mulf %62, %73 : vector<32x1xf32>
      %76 = arith.subf %74, %75 : vector<32x1xf32>
      %c0_42 = arith.constant 0 : index
      %c0_43 = arith.constant 0 : index
      %77 = vector.load %arg6[%c0_42, %c0_43] : memref<96x32xbf16, #tpu.memory_space<vmem>>, vector<96x32xbf16>
      %c0_44 = arith.constant 0 : index
      %c0_45 = arith.constant 0 : index
      %78 = vector.load %arg7[%c0_44, %c0_45] : memref<96x1xf32, #tpu.memory_space<vmem>>, vector<96x1xf32>
      %c0_46 = arith.constant 0 : index
      %c0_47 = arith.constant 0 : index
      %c0_48 = arith.constant 0 : index
      %79 = vector.load %arg2[%c0_46, %c0_47, %c0_48] : memref<1x32x256xf32, #tpu.memory_space<vmem>>, vector<1x32x256xf32>
      %80 = vector.shape_cast %79 : vector<1x32x256xf32> to vector<32x256xf32>
      %81 = vector.broadcast %73 : vector<32x1xf32> to vector<32x256xf32>
      %82 = arith.mulf %80, %81 : vector<32x256xf32>
      %83 = vector.broadcast %76 : vector<32x1xf32> to vector<32x256xf32>
      %84 = arith.addf %82, %83 : vector<32x256xf32>
      %85 = arith.truncf %84 : vector<32x256xf32> to vector<32x256xbf16>
      %cst_49 = arith.constant dense<0.000000e+00> : vector<96x256xf32>
      %86 = tpu.matmul %77, %85, %cst_49 {dimension_numbers = #tpu.dot_dimension_numbers<[1], [0], [0], [1], [0, 0, 1, 1], [], []>} : vector<96x32xbf16>, vector<32x256xbf16>, vector<96x256xf32> -> vector<96x256xf32>
      %87 = vector.broadcast %78 : vector<96x1xf32> to vector<96x256xf32>
      %88 = arith.addf %86, %87 : vector<96x256xf32>
      %89 = arith.truncf %88 : vector<96x256xf32> to vector<96x256xbf16>
      %90 = vector.extract_strided_slice %89 {offsets = [0, 0], sizes = [32, 256], strides = [1, 1]} : vector<96x256xbf16> to vector<32x256xbf16>
      %c0_50 = arith.constant 0 : index
      %c0_51 = arith.constant 0 : index
      %91 = vector.load %arg11[%c0_50, %c0_51] : memref<32x256xbf16, #tpu.memory_space<vmem>>, vector<32x256xbf16>
      tpu.vector_store %arg11[%c0_50, %c0_51], %90 {strides = array<i32>} : memref<32x256xbf16, #tpu.memory_space<vmem>>, vector<32x256xbf16>,
      %92 = vector.extract_strided_slice %89 {offsets = [32, 0], sizes = [32, 256], strides = [1, 1]} : vector<96x256xbf16> to vector<32x256xbf16>
      %c0_52 = arith.constant 0 : index
      %c0_53 = arith.constant 0 : index
      %93 = vector.load %arg12[%c0_52, %c0_53] : memref<32x256xbf16, #tpu.memory_space<vmem>>, vector<32x256xbf16>
      tpu.vector_store %arg12[%c0_52, %c0_53], %92 {strides = array<i32>} : memref<32x256xbf16, #tpu.memory_space<vmem>>, vector<32x256xbf16>,
      %94 = vector.extract_strided_slice %89 {offsets = [64, 0], sizes = [32, 256], strides = [1, 1]} : vector<96x256xbf16> to vector<32x256xbf16>
      %c0_54 = arith.constant 0 : index
      %c0_55 = arith.constant 0 : index
      %95 = vector.load %arg13[%c0_54, %c0_55] : memref<32x256xbf16, #tpu.memory_space<vmem>>, vector<32x256xbf16>
      tpu.vector_store %arg13[%c0_54, %c0_55], %94 {strides = array<i32>} : memref<32x256xbf16, #tpu.memory_space<vmem>>, vector<32x256xbf16>,
    } else {
    }
    %c256_i32 = arith.constant 256 : i32
    %3 = arith.muli %arg1, %c256_i32 : i32
    %4 = tpu.assume_multiple %3, 256 : i32
    %c0 = arith.constant 0 : index
    %5 = arith.index_cast %4 : i32 to index
    %6 = vector.load %arg11[%c0, %5] : memref<32x256xbf16, #tpu.memory_space<vmem>>, vector<32x256xbf16>
    %cst = arith.constant -1.000000e+30 : f32
    %7 = vector.broadcast %cst : f32 to vector<1x256xf32>
    %cst_1 = arith.constant 0.000000e+00 : f32
    %8 = vector.broadcast %cst_1 : f32 to vector<1x256xf32>
    %cst_2 = arith.constant 0.000000e+00 : f32
    %9 = vector.broadcast %cst_2 : f32 to vector<32x256xf32>
    %c0_3 = arith.constant 0 : index
    %c0_4 = arith.constant 0 : index
    %10 = vector.load %arg12[%c0_3, %c0_4] : memref<32x256xbf16, #tpu.memory_space<vmem>>, vector<32x256xbf16>
    %c0_5 = arith.constant 0 : index
    %c0_6 = arith.constant 0 : index
    %11 = vector.load %arg13[%c0_5, %c0_6] : memref<32x256xbf16, #tpu.memory_space<vmem>>, vector<32x256xbf16>
    %cst_7 = arith.constant dense<0.000000e+00> : vector<256x256xf32>
    %12 = tpu.matmul %10, %6, %cst_7 {dimension_numbers = #tpu.dot_dimension_numbers<[0], [0], [1], [1], [0, 1, 1, 1], [], []>} : vector<32x256xbf16>, vector<32x256xbf16>, vector<256x256xf32> -> vector<256x256xf32>
    %cst_8 = arith.constant dense<0xFF800000> : vector<256xf32>
    %13 = vector.multi_reduction <maximumf>, %12, %cst_8 [0] : vector<256x256xf32> to vector<256xf32>
    %14 = vector.shape_cast %13 : vector<256xf32> to vector<1x256xf32>
    %15 = arith.maximumf %7, %14 : vector<1x256xf32>
    %16 = arith.subf %7, %15 : vector<1x256xf32>
    %17 = math.exp %16 : vector<1x256xf32>
    %18 = vector.broadcast %15 : vector<1x256xf32> to vector<256x256xf32>
    %19 = arith.subf %12, %18 : vector<256x256xf32>
    %20 = math.exp %19 : vector<256x256xf32>
    %21 = arith.mulf %17, %8 : vector<1x256xf32>
    %cst_9 = arith.constant dense<0.000000e+00> : vector<256xf32>
    %22 = vector.multi_reduction <add>, %20, %cst_9 [0] : vector<256x256xf32> to vector<256xf32>
    %23 = vector.shape_cast %22 : vector<256xf32> to vector<1x256xf32>
    %24 = arith.addf %21, %23 : vector<1x256xf32>
    %25 = vector.broadcast %17 : vector<1x256xf32> to vector<32x256xf32>
    %26 = arith.mulf %25, %9 : vector<32x256xf32>
    %27 = arith.truncf %20 : vector<256x256xf32> to vector<256x256xbf16>
    %cst_10 = arith.constant dense<0.000000e+00> : vector<32x256xf32>
    %28 = tpu.matmul %11, %27, %cst_10 {dimension_numbers = #tpu.dot_dimension_numbers<[1], [0], [0], [1], [0, 0, 1, 1], [], []>} : vector<32x256xbf16>, vector<256x256xbf16>, vector<32x256xf32> -> vector<32x256xf32>
    %29 = arith.addf %26, %28 : vector<32x256xf32>
    %30 = tpu.reciprocal %24 {approx = true} : vector<1x256xf32> -> vector<1x256xf32>
    %31 = vector.broadcast %30 : vector<1x256xf32> to vector<32x256xf32>
    %32 = arith.mulf %29, %31 : vector<32x256xf32>
    %33 = arith.truncf %32 : vector<32x256xf32> to vector<32x256xbf16>
    %c0_11 = arith.constant 0 : index
    %c0_12 = arith.constant 0 : index
    %34 = vector.load %arg8[%c0_11, %c0_12] : memref<32x32xbf16, #tpu.memory_space<vmem>>, vector<32x32xbf16>
    %cst_13 = arith.constant dense<0.000000e+00> : vector<32x256xf32>
    %35 = tpu.matmul %34, %33, %cst_13 {dimension_numbers = #tpu.dot_dimension_numbers<[1], [0], [0], [1], [0, 0, 1, 1], [], []>} : vector<32x32xbf16>, vector<32x256xbf16>, vector<32x256xf32> -> vector<32x256xf32>
    %c0_14 = arith.constant 0 : index
    %c0_15 = arith.constant 0 : index
    %36 = vector.load %arg9[%c0_14, %c0_15] : memref<32x1xf32, #tpu.memory_space<vmem>>, vector<32x1xf32>
    %37 = vector.broadcast %36 : vector<32x1xf32> to vector<32x256xf32>
    %38 = arith.addf %35, %37 : vector<32x256xf32>
    %c0_16 = arith.constant 0 : index
    %c0_17 = arith.constant 0 : index
    %39 = arith.index_cast %4 : i32 to index
    %40 = vector.load %arg2[%c0_16, %c0_17, %39] : memref<1x32x256xf32, #tpu.memory_space<vmem>>, vector<1x32x256xf32>
    %41 = vector.shape_cast %40 : vector<1x32x256xf32> to vector<32x256xf32>
    %42 = arith.addf %41, %38 : vector<32x256xf32>
    %c0_18 = arith.constant 0 : index
    %c0_19 = arith.constant 0 : index
    %c0_20 = arith.constant 0 : index
    %43 = vector.load %arg10[%c0_18, %c0_19, %c0_20] : memref<1x32x256xf32, #tpu.memory_space<vmem>>, vector<1x32x256xf32>
    %44 = vector.shape_cast %43 : vector<1x32x256xf32> to vector<32x256xf32>
    %45 = vector.shape_cast %42 : vector<32x256xf32> to vector<1x32x256xf32>
    tpu.vector_store %arg10[%c0_18, %c0_19, %c0_20], %45 {strides = array<i32>} : memref<1x32x256xf32, #tpu.memory_space<vmem>>, vector<1x32x256xf32>,
    return
  }
  func.func @transform_0(%arg0: i32, %arg1: i32) -> (i32, i32, i32) {
    %c0_i32 = arith.constant 0 : i32
    %c0_i32_0 = arith.constant 0 : i32
    %c0_i32_1 = arith.constant 0 : i32
    return %arg0, %c0_i32, %c0_i32_0 : i32, i32, i32
  }
  func.func @transform_1(%arg0: i32, %arg1: i32) -> (i32, i32) {
    %c0_i32 = arith.constant 0 : i32
    %c0_i32_0 = arith.constant 0 : i32
    %c0_i32_1 = arith.constant 0 : i32
    return %c0_i32, %c0_i32_0 : i32, i32
  }
  func.func @transform_2(%arg0: i32, %arg1: i32) -> (i32, i32) {
    %c0_i32 = arith.constant 0 : i32
    %c0_i32_0 = arith.constant 0 : i32
    %c0_i32_1 = arith.constant 0 : i32
    return %c0_i32, %c0_i32_0 : i32, i32
  }
  func.func @transform_3(%arg0: i32, %arg1: i32) -> (i32, i32) {
    %c0_i32 = arith.constant 0 : i32
    %c0_i32_0 = arith.constant 0 : i32
    %c0_i32_1 = arith.constant 0 : i32
    return %c0_i32, %c0_i32_0 : i32, i32
  }
  func.func @transform_4(%arg0: i32, %arg1: i32) -> (i32, i32) {
    %c0_i32 = arith.constant 0 : i32
    %c0_i32_0 = arith.constant 0 : i32
    %c0_i32_1 = arith.constant 0 : i32
    return %c0_i32, %c0_i32_0 : i32, i32
  }
  func.func @transform_5(%arg0: i32, %arg1: i32) -> (i32, i32) {
    %c0_i32 = arith.constant 0 : i32
    %c0_i32_0 = arith.constant 0 : i32
    %c0_i32_1 = arith.constant 0 : i32
    return %c0_i32, %c0_i32_0 : i32, i32
  }
  func.func @transform_6(%arg0: i32, %arg1: i32) -> (i32, i32) {
    %c0_i32 = arith.constant 0 : i32
    %c0_i32_0 = arith.constant 0 : i32
    %c0_i32_1 = arith.constant 0 : i32
    return %c0_i32, %c0_i32_0 : i32, i32
  }
  func.func @transform_7(%arg0: i32, %arg1: i32) -> (i32, i32) {
    %c0_i32 = arith.constant 0 : i32
    %c0_i32_0 = arith.constant 0 : i32
    %c0_i32_1 = arith.constant 0 : i32
    return %c0_i32, %c0_i32_0 : i32, i32
  }
  func.func @transform_8(%arg0: i32, %arg1: i32) -> (i32, i32, i32) {
    %c0_i32 = arith.constant 0 : i32
    %c0_i32_0 = arith.constant 0 : i32
    return %arg0, %c0_i32, %arg1 : i32, i32, i32
  }
}

</mosaic_0001>

<bundles_post_ra>
// kernel: tpu_custom_call.1
= control target key start
LH: loop header
LB: loop body
LE: loop exit
PB: predicated region body
PF: predicated region fallthrough
CT: control target
= control target key end

     0   :  { %13 = vsyncpa [#allocation6], 0  ;;  %s3253_s0 = inlined_call_operand.vmem [shape: f32[2,32,256], index: 0, kind: input, shape index: {}]   ;;  %s3254_s1 = inlined_call_operand.vmem [shape: f32[32,32], index: 1, kind: input, shape index: {}]   ;;  %s3255_s2 = inlined_call_operand.vmem [shape: f32[32,1], index: 2, kind: input, shape index: {}]   ;;  %s3256_s3 = inlined_call_operand.vmem [shape: f32[32,1], index: 3, kind: input, shape index: {}]   ;;  %s3257_s4 = inlined_call_operand.vmem [shape: bf16[96,32], index: 4, kind: input, shape index: {}]   ;;  %s3258_s5 = inlined_call_operand.vmem [shape: f32[96,1], index: 5, kind: input, shape index: {}]   ;;  %s3259_s6 = inlined_call_operand.vmem [shape: bf16[32,32], index: 6, kind: input, shape index: {}]   ;;  %s3260_s7 = inlined_call_operand.vmem [shape: f32[32,1], index: 7, kind: input, shape index: {}]   ;;  %s3261_s8 = inlined_call_operand.hbm [shape: f32[2,32,256], index: 8, kind: output, shape index: {}]  }
   0x1   :  { %15 = vsyncpa [#allocation6 + $0x1], 0  ;;  %s2346_s27 = smov 0   ;;  %s2348_s28 = smov 0  }
   0x2   :  { %s2350_s29 = smov 0   ;;  %s2352_s30 = smov 0  }
   0x3   :  { %s2354_s9 = smov 0   ;;  %s2356_s10 = smov 0  }
   0x4 LB: > { %s1838_s11 = sadd.s32 4294967295, %s2296_s10   ;;  %s1839_s12 = sadd.s32 4294967294, %s2296_s10   ;;  %s2296_s10 = sphi %s2356_s10, %s21_s10   ;;  %s2292_s9 = sphi %s2354_s9, %s3331_s9   ;;  %s2288_s30 = sphi %s2352_s30, %s3330_s30   ;;  %s2284_s29 = sphi %s2350_s29, %s3329_s29   ;;  %s2280_s28 = sphi %s2348_s28, %s3328_s28   ;;  %s2276_s27 = sphi %s2346_s27, %s3327_s27  }
   0x5   : > { %s33_s13 = sadd.s32 1, %s2292_s9  ;;  %s215_s14 = sadd.s32 1, %s2284_s29 }
   0x6   : > { %p35_p0 = scmp.ge.s32.totalorder %s33_s13, 2  ;;  %p225_p1 = scmp.ne.s32.totalorder %s2284_s29, %s2280_s28 }
   0x7   : > { %p226_p2 = scmp.eq.s32.totalorder %s1838_s11, 1  ;;  %p231_p3 = scmp.ne.s32.totalorder %s2280_s28, %s2276_s27 }
   0x8   : > { %s3333_s13 = smov (%p35_p0, %s33_s13), 0  ;;  %p232_p5 = scmp.eq.s32.totalorder %s1839_s12, 1 }
   0x9   : > { %p2386_p4 = por %p226_p2, %p225_p1  ;;  %s210_s16 = ssub.s32 %s2292_s9, %s3333_s13 }
   0xa   : > { %p1842_p6 = scmp.ge.s32.totalorder %s2296_s10, 1  ;;  %p213_p7 = scmp.eq.s32.totalorder %s210_s16, 0 }
   0xb   : > { %p2393_p8 = por %p232_p5, %p231_p3  ;;  %p279_p9 = scmp.lt.s32.totalorder %s2296_s10, 3 }
   0xc   : > { %s2399_s18 = scalar_select %p213_p7, %s2284_s29, %s215_s14  }
   0xd   : > { %p280_p10 = pnand %p1842_p6, %p279_p9 }
   0xf   : > { %283 = sbr.rel (%p280_p10) target bundleno = 1625 (0x659), region = 52 }
  0x14   : > { %p313_p11 = scmp.lt.s32.totalorder %s2288_s30, 1  ;;  %v372_v30 = vld [vmem:[%s3254_s1] sm:$0xff]  ;;  %vm376_vm0 = vcmask 261120   ;;  %v373_v33 = vld [vmem:[%s3254_s1 + $0x8] sm:$0xff]  ;;  %v374_v34 = vld [vmem:[%s3254_s1 + $0x10] sm:$0xff]  ;;  %v2298_v51 = vmov 0  }
  0x15   : > { %v375_v35 = vld [vmem:[%s3254_s1 + $0x18] sm:$0xff]  ;;  %2071 = vset.pattern.permute.xlu2 %v2298_v51  ;;  %2073 = vset.pattern.permute.xlu1 %v2298_v51  ;;  %s310_s16 = sand.u32 1, %s2280_s28   ;;  %s2008_s21 = sshll.u32 %s2288_s30, 6 }
  0x16   : > { %s314_s19 = scalar_select %p313_p11, %s2288_s30, 1  ;;  %2072 = vset.pattern.permute.xlu0 %v2298_v51 }
  0x17   : > { %s1757_s25 = scalar_lea.hbm %s3261_s8, %s2008_s21  ;;  %s1744_s12 = scalar_lea.sflag [#allocation6], %s310_s16 }
  0x18   : > { %s1987_s20 = sshll.u32 %s314_s19, 6  ;;  %s1843_s19 = sshll.u32 %s310_s16, 6 }
  0x19   : > { %s2406_s23 = scalar_lea.vmem %s3253_s0, %s1987_s20  ;;  %s3197_s20 = scalar_lea.vmem [#allocation5], %s1843_s19 }
  0x1a   : > { %v2409_v0 = vld [vmem:[%s2406_s23 + $0x30] sm:$0xff]  ;;  %v2412_v1 = vld [vmem:[%s2406_s23 + $0x38] sm:$0xff]  ;;  %v2423_v5 = vld [vmem:[%s2406_s23 + $0x20] sm:$0xff]  ;;  %s1758_s26 = sshll.u32 %s3197_s20, 4  ;;  %s1760_s11 = sshll.u32 %s1757_s25, 4  ;;  %s1759_s26 = int_to_ptr.vmem [resolvable:$true] %s1758_s26  ;;  %s1761_s11 = int_to_ptr.hbm [resolvable:$true] %s1760_s11 }
  0x1b   : > { %v2415_v2 = vld [vmem:[%s2406_s23 + $0x10] sm:$0xff]  ;;  %v341_v3 = vadd.f32 %v2412_v1, %v2409_v0  ;;  %v2420_v4 = vld [vmem:[%s2406_s23 + $0x18] sm:$0xff]  ;;  %v2426_v6 = vld [vmem:[%s2406_s23 + $0x28] sm:$0xff]  ;;  %v352_v8 = vmul.f32 %v2423_v5, %v2423_v5  ;;  %v354_v11 = vmul.f32 %v2409_v0, %v2409_v0  ;;  %v355_v12 = vmul.f32 %v2412_v1, %v2412_v1  ;;  %s2232_s14 = sshra.s32 %s1761_s11, 4  ;;  %s2238_s22 = scalar_lea.hbm %s3261_s8, 128  ;;  %s2233_s14 = int_to_ptr.hbm [resolvable:$true] %s2232_s14 }
  0x1c   : > { %v335_v7 = vadd.f32 %v2420_v4, %v2415_v2  ;;  %v353_v9 = vmul.f32 %v2426_v6, %v2426_v6  ;;  %v338_v13 = vadd.f32 %v2426_v6, %v2423_v5  ;;  %v2441_v14 = vld [vmem:[%s2406_s23] sm:$0xff]  ;;  %v2444_v15 = vld [vmem:[%s2406_s23 + $0x8] sm:$0xff]  ;;  %v350_v18 = vmul.f32 %v2415_v2, %v2415_v2  ;;  %s2234_s30 = scalar_lea.hbm %s2233_s14, 64  ;;  %p2239_p1 = scmp.lt.s32.totalorder %s2233_s14, %s3261_s8 }
  0x1d   : > { %342 = vadd.xlane.f32.xlu0 %v341_v3  ;;  %v365_v16 = vadd.f32 %v355_v12, %v354_v11  ;;  %v332_v17 = vadd.f32 %v2444_v15, %v2441_v14  ;;  %v351_v19 = vmul.f32 %v2420_v4, %v2420_v4  ;;  %v348_v20 = vmul.f32 %v2441_v14, %v2441_v14  ;;  %p2235_p12 = scmp.ne.s32.totalorder %s2233_s14, %s2234_s30  ;;  %p2240_p2 = scmp.lt.s32.totalorder %s2238_s22, %s2234_s30 }
  0x1e   : > { %336 = vadd.xlane.f32.xlu1 %v335_v7  ;;  %v362_v10 = vadd.f32 %v353_v9, %v352_v8  ;;  %v349_v21 = vmul.f32 %v2444_v15, %v2444_v15 }
  0x1f   : > { %v359_v22 = vadd.f32 %v351_v19, %v350_v18  ;;  %p2236_p13 = pnand %p2235_p12, %p2386_p4  ;;  %p2241_p3 = por %p2240_p2, %p2239_p1 }
  0x20   : > { %363 = vadd.xlane.f32.xlu2 %v362_v10  ;;  %v356_v23 = vadd.f32 %v349_v21, %v348_v20 }
  0x21   : > { %p2237_p0 = pneg %p2236_p13 }
  0x23   : > { %p2242_p5 = pnand %p2241_p3, %p2237_p0 }
  0x25   : > { %339 = vadd.xlane.f32.xlu0 %v338_v13 }
  0x26   : > { %366 = vadd.xlane.f32.xlu1 %v365_v16 }
  0x28   : > { %333 = vadd.xlane.f32.xlu2 %v332_v17 }
  0x2d   : > { %360 = vadd.xlane.f32.xlu0 %v359_v22 }
  0x2e   : > { %357 = vadd.xlane.f32.xlu1 %v356_v23 }
  0x90   : > { %v343_v24 = vpop.xlane.xlu0 %342 }
  0x91   : > { %v337_v25 = vpop.xlane.xlu1 %336  ;;  %401 = vmatpush.msra.mxu0 %v343_v24 }
  0x93   : > { %v364_v26 = vpop.xlane.xlu2 %363 }
  0x98   : > { %v340_v27 = vpop.xlane.xlu0 %339 }
  0x99   : > { %v367_v28 = vpop.xlane.xlu1 %366  ;;  %402 = vmatpush.msra.mxu0 %v340_v27 }
  0x9a   : > { %430 = vmatpush.msra.mxu1 %v367_v28 }
  0x9b   : > { %403 = vmatpush.msra.mxu0 %v337_v25  ;;  %v334_v29 = vpop.xlane.xlu2 %333 }
  0x9c   : > { %431 = vmatpush.msra.mxu1 %v364_v26 }
  0x9d   : > { %404 = vmatpush.msra.mxu0 %v334_v29 }
  0x9e   : > { %1846 = vmatmul.msk.f32.vlgmr.msra.gmra.mxu0 %vm376_vm0, %v372_v30 }
  0xa0   : > { %v361_v31 = vpop.xlane.xlu0 %360 }
  0xa1   : > { %432 = vmatpush.msra.mxu1 %v361_v31  ;;  %v358_v32 = vpop.xlane.xlu1 %357 }
  0xa3   : > { %433 = vmatpush.msra.mxu1 %v358_v32 }
  0xa4   : > { %1850 = vmatmul.msk.f32.vlgmr.msra.gmra.mxu1 %vm376_vm0, %v372_v30  ;;  %v513_v30 = vld [vmem:[%s3255_s2 + $0x10] sm:$0xff] }
  0xa6   : > { %1847 = vmatmul.msk.f32.gmra.mxu0 %vm376_vm0, %v373_v33 }
  0xac   : > { %1851 = vmatmul.msk.f32.gmra.mxu1 %vm376_vm0, %v373_v33 }
  0xae   : > { %1848 = vmatmul.msk.f32.gmra.mxu0 %vm376_vm0, %v374_v34 }
  0xb4   : > { %1852 = vmatmul.msk.f32.gmra.mxu1 %vm376_vm0, %v374_v34 }
  0xb6   : > { %1849 = vmatmul.msk.f32.gmra.mxu0 %vm376_vm0, %v375_v35 }
  0xbc   : > { %1853 = vmatmul.msk.f32.gmra.mxu1 %vm376_vm0, %v375_v35  ;;  %v521_v35 = vld [vmem:[%s3256_s3 + $0x10] sm:$0xff] }
 0x11b   : > { %v406_v36 = vpop.f32.mrf.mxu0 }
 0x11c   : > { %v2476_v37 = vmul.f32 0.0009765625, %v406_v36 }
 0x11e   : > { %v455_v39 = vmul.f32 %v2476_v37, %v2476_v37 }
 0x121   : > { %v435_v38 = vpop.f32.mrf.mxu1 }
 0x122   : > { %v451_v40 = vmul.f32 0.0009765625, %v435_v38 }
 0x123   : > { %v409_v41 = vpop.f32.mrf.mxu0 }
 0x124   : > { %v2480_v42 = vmul.f32 0.0009765625, %v409_v41  ;;  %v459_v43 = vsub.f32 %v451_v40, %v455_v39 }
 0x126   : > { %v456_v44 = vmul.f32 %v2480_v42, %v2480_v42  ;;  %v463_v47 = vmax.f32 %v459_v43, 0.0 }
 0x128   : > { %v467_v52 = vadd.f32 1e-05, %v463_v47 }
 0x129   : > { %v438_v45 = vpop.f32.mrf.mxu1 }
 0x12a   : > { %v452_v46 = vmul.f32 0.0009765625, %v438_v45  ;;  %2074 = vrsqrt.f32 %v467_v52  ;;  %vm477_vm5 = vweird.f32 %v467_v52 }
 0x12b   : > { %v412_v48 = vpop.f32.mrf.mxu0 }
 0x12c   : > { %v460_v49 = vsub.f32 %v452_v46, %v456_v44  ;;  %v449_v50 = vmul.f32 0.0009765625, %v412_v48  ;;  %v511_v44 = vld [vmem:[%s3255_s2] sm:$0xff]  ;;  %v514_v46 = vld [vmem:[%s3255_s2 + $0x18] sm:$0xff] }
 0x12e   : > { %v464_v53 = vmax.f32 %v460_v49, 0.0  ;;  %v457_v54 = vmul.f32 %v449_v50, %v449_v50 }
 0x130   : > { %v2484_v58 = vadd.f32 1e-05, %v464_v53  ;;  %v2075_v3 = vpop.eup %2074 }
 0x131   : > { %v441_v55 = vpop.f32.mrf.mxu1  ;;  %v472_v9 = vmul.f32 %v2075_v3, %v467_v52  ;;  %vm478_vm4 = vweird.f32 %v2075_v3  ;;  %v512_v52 = vld [vmem:[%s3255_s2 + $0x8] sm:$0xff] }
 0x132   : > { %v453_v56 = vmul.f32 0.0009765625, %v441_v55  ;;  %2076 = vrsqrt.f32 %v2484_v58  ;;  %vm479_vm8 = vmor %vm477_vm5, %vm478_vm4  ;;  %vm487_vm11 = vweird.f32 %v2484_v58  ;;  %v522_v55 = vld [vmem:[%s3256_s3 + $0x18] sm:$0xff] }
 0x133   : > { %v415_v57 = vpop.f32.mrf.mxu0  ;;  %v473_v16 = vmul.f32 %v2075_v3, %v472_v9  ;;  %v551_v9 = vld [vmem:[%s3258_s5 + $0x40] sm:$0xff] }
 0x134   : > { %v461_v59 = vsub.f32 %v453_v56, %v457_v54  ;;  %v2486_v60 = vmul.f32 0.0009765625, %v415_v57  ;;  %v547_v56 = vld [vmem:[%s3258_s5 + $0x20] sm:$0xff] }
 0x135   : > { %v474_v21 = vmul.f32 0.5, %v473_v16  ;;  %v552_v16 = vld [vmem:[%s3258_s5 + $0x48] sm:$0xff] }
 0x136   : > { %v465_v61 = vmax.f32 %v461_v59, 0.0  ;;  %v458_v63 = vmul.f32 %v2486_v60, %v2486_v60  ;;  %v520_v59 = vld [vmem:[%s3256_s3 + $0x8] sm:$0xff] }
 0x137   : > { %v475_v26 = vsub.f32 1.5, %v474_v21 }
 0x138   : > { %v469_v62 = vadd.f32 1e-05, %v465_v61  ;;  %v2077_v11 = vpop.eup %2076 }
 0x139   : > { %v444_v7 = vpop.f32.mrf.mxu1  ;;  %v482_v18 = vmul.f32 %v2077_v11, %v2484_v58  ;;  %v476_v36 = vmul.f32 %v2075_v3, %v475_v26  ;;  %vm488_vm9 = vweird.f32 %v2077_v11 }
 0x13a   : > { %2078 = vrsqrt.f32 %v469_v62  ;;  %v454_v8 = vmul.f32 0.0009765625, %v444_v7  ;;  %vm497_vm2 = vweird.f32 %v469_v62  ;;  %vm489_vm12 = vmor %vm487_vm11, %vm488_vm9  ;;  %v548_v7 = vld [vmem:[%s3258_s5 + $0x28] sm:$0xff] }
 0x13b   : > { %v483_v22 = vmul.f32 %v2077_v11, %v482_v18  ;;  %v480_v43 = vsel %vm479_vm8, %v2075_v3, %v476_v36  ;;  %v554_v18 = vld [vmem:[%s3258_s5 + $0x58] sm:$0xff] }
 0x13c   : > { %v462_v10 = vsub.f32 %v454_v8, %v458_v63  ;;  %v515_v49 = vmul.f32 %v511_v44, %v480_v43  ;;  %v550_v63 = vld [vmem:[%s3258_s5 + $0x38] sm:$0xff] }
 0x13d   : > { %v484_v27 = vmul.f32 0.5, %v483_v22  ;;  %v546_v8 = vld [vmem:[%s3258_s5 + $0x18] sm:$0xff] }
 0x13e   : > { %v466_v12 = vmax.f32 %v462_v10, 0.0  ;;  %v545_v10 = vld [vmem:[%s3258_s5 + $0x10] sm:$0xff] }
 0x13f   : > { %v485_v38 = vsub.f32 1.5, %v484_v27 }
 0x140   : > { %v2079_v13 = vpop.eup %2078  ;;  %v470_v17 = vadd.f32 1e-05, %v466_v12  ;;  %v544_v12 = vld [vmem:[%s3258_s5 + $0x8] sm:$0xff] }
 0x141   : > { %v492_v19 = vmul.f32 %v2079_v13, %v469_v62  ;;  %vm498_vm1 = vweird.f32 %v2079_v13  ;;  %v486_v47 = vmul.f32 %v2077_v11, %v485_v38  ;;  %v519_v62 = vld [vmem:[%s3256_s3] sm:$0xff] }
 0x142   : > { %2080 = vrsqrt.f32 %v470_v17  ;;  %vm499_vm3 = vmor %vm497_vm2, %vm498_vm1  ;;  %vm507_vm6 = vweird.f32 %v470_v17 }
 0x143   : > { %v493_v20 = vmul.f32 %v2079_v13, %v492_v19  ;;  %v490_v51 = vsel %vm489_vm12, %v2077_v11, %v486_v47  ;;  %v553_v11 = vld [vmem:[%s3258_s5 + $0x50] sm:$0xff]  ;;  %v1640_v19 = vld [vmem:[%s3260_s7 + $0x8] sm:$0xff]  ;;  %v1988_v47 = vld [vmem:[%s3257_s4] sm:$0xff] }
 0x144   : > { %v516_v53 = vmul.f32 %v512_v52, %v490_v51 }
 0x145   : > { %v494_v23 = vmul.f32 0.5, %v493_v20  ;;  %v1642_v20 = vld [vmem:[%s3260_s7 + $0x18] sm:$0xff] }
 0x146   : > { %v524_v58 = vmul.f32 %v516_v53, %v2480_v42  ;;  %v549_v42 = vld [vmem:[%s3258_s5 + $0x30] sm:$0xff] }
 0x147   : > { %v495_v24 = vsub.f32 1.5, %v494_v23 }
 0x148   : > { %v2081_v25 = vpop.eup %2080  ;;  %v528_v61 = vsub.f32 %v520_v59, %v524_v58 }
 0x149   : > { %v502_v28 = vmul.f32 %v2081_v25, %v470_v17  ;;  %v496_v29 = vmul.f32 %v2079_v13, %v495_v24  ;;  %vm508_vm7 = vweird.f32 %v2081_v25  ;;  %v1641_v17 = vld [vmem:[%s3260_s7 + $0x10] sm:$0xff] }
 0x14a   : > { %vm509_vm10 = vmor %vm507_vm6, %vm508_vm7 }
 0x14b   : > { %v503_v31 = vmul.f32 %v2081_v25, %v502_v28  ;;  %v500_v32 = vsel %vm499_vm3, %v2079_v13, %v496_v29  ;;  %v1639_v13 = vld [vmem:[%s3260_s7] sm:$0xff] }
 0x14c   : > { %v517_v33 = vmul.f32 %v513_v30, %v500_v32 }
 0x14d   : > { %v504_v34 = vmul.f32 0.5, %v503_v31 }
 0x14e   : > { %567 = vperm.xlu2 %2071, %v517_v33   ;;  %v525_v39 = vmul.f32 %v517_v33, %v449_v50 }
 0x14f   : > { %v505_v40 = vsub.f32 1.5, %v504_v34 }
 0x150   : > { %v529_v41 = vsub.f32 %v521_v35, %v525_v39 }
 0x151   : > { %v506_v45 = vmul.f32 %v2081_v25, %v505_v40 }
 0x152   : > { %595 = vperm.xlu1 %2073, %v529_v41  }
 0x153   : > { %v510_v48 = vsel %vm509_vm10, %v2081_v25, %v506_v45 }
 0x154   : > { %v518_v50 = vmul.f32 %v514_v46, %v510_v48  ;;  %v1993_v48 = vld [vmem:[%s3257_s4 + $0x28] sm:$0xff] }
 0x156   : > { %557 = vperm.xlu2 %2071, %v515_v49   ;;  %572 = vperm.xlu0 %2072, %v518_v50   ;;  %v526_v54 = vmul.f32 %v518_v50, %v2486_v60  ;;  %v523_v60 = vmul.f32 %v515_v49, %v2476_v37  ;;  %v543_v37 = vld [vmem:[%s3258_s5] sm:$0xff] }
 0x158   : > { %v530_v57 = vsub.f32 %v522_v55, %v526_v54  ;;  %v527_v3 = vsub.f32 %v519_v62, %v523_v60 }
 0x15a   : > { %562 = vperm.xlu1 %2073, %v516_v53  }
 0x15e   : > { %637 = vperm.xlu0 %2072, %v547_v56   ;;  %600 = vperm.xlu2 %2071, %v530_v57  }
 0x162   : > { %590 = vperm.xlu1 %2073, %v528_v61  }
 0x166   : > { %652 = vperm.xlu0 %2072, %v550_v63   ;;  %585 = vperm.xlu2 %2071, %v527_v3  }
 0x16a   : > { %647 = vperm.xlu1 %2073, %v549_v42  }
 0x16e   : > { %617 = vperm.xlu0 %2072, %v543_v37   ;;  %642 = vperm.xlu2 %2071, %v548_v7  }
 0x172   : > { %632 = vperm.xlu1 %2073, %v546_v8  }
 0x176   : > { %657 = vperm.xlu0 %2072, %v551_v9   ;;  %627 = vperm.xlu2 %2071, %v545_v10  }
 0x17e   : > { %667 = vperm.xlu0 %2072, %v553_v11   ;;  %622 = vperm.xlu2 %2071, %v544_v12  }
 0x186   : > { %1645 = vperm.xlu0 %2072, %v1639_v13   ;;  %662 = vperm.xlu2 %2071, %v552_v16  }
 0x18e   : > { %1655 = vperm.xlu0 %2072, %v1641_v17   ;;  %672 = vperm.xlu2 %2071, %v554_v18  }
 0x196   : > { %1650 = vperm.xlu2 %2071, %v1640_v19  }
 0x19e   : > { %1660 = vperm.xlu2 %2071, %v1642_v20  }
 0x1a8   : > { %v568_v21 = vpop.permute.xlu2 %567 }
 0x1a9   : > { %v579_v26 = vmul.f32 %v568_v21, %v2423_v5  ;;  %v580_v27 = vmul.f32 %v568_v21, %v2426_v6 }
 0x1b0   : > { %v558_v22 = vpop.permute.xlu2 %557 }
 0x1b1   : > { %v575_v39 = vmul.f32 %v558_v22, %v2441_v14  ;;  %v576_v5 = vmul.f32 %v558_v22, %v2444_v15  ;;  %v1991_v14 = vld [vmem:[%s3257_s4 + $0x18] sm:$0xff]  ;;  %v1992_v15 = vld [vmem:[%s3257_s4 + $0x20] sm:$0xff] }
 0x1b8   : > { %v601_v24 = vpop.permute.xlu2 %600 }
 0x1c0   : > { %v586_v38 = vpop.permute.xlu2 %585 }
 0x1c1   : > { %v604_v41 = vadd.f32 %v586_v38, %v576_v5 }
 0x1c4   : > { %v596_v23 = vpop.permute.xlu1 %595 }
 0x1c5   : > { %v607_v30 = vadd.f32 %v596_v23, %v579_v26  ;;  %v608_v31 = vadd.f32 %v596_v23, %v580_v27 }
 0x1c8   : > { %v573_v25 = vpop.permute.xlu0 %572  ;;  %v643_v50 = vpop.permute.xlu2 %642 }
 0x1c9   : > { %v581_v28 = vmul.f32 %v573_v25, %v2409_v0  ;;  %v582_v29 = vmul.f32 %v573_v25, %v2412_v1  ;;  %v603_v1 = vadd.f32 %v586_v38, %v575_v39 }
 0x1cb   : > { %v609_v32 = vadd.f32 %v601_v24, %v581_v28  ;;  %v610_v33 = vadd.f32 %v601_v24, %v582_v29 }
 0x1cc   : > { %v563_v34 = vpop.permute.xlu1 %562 }
 0x1cd   : > { %v613_v35 = vpack.c.bf16 %v609_v32, %v607_v30  ;;  %v614_v36 = vpack.c.bf16 %v610_v33, %v608_v31  ;;  %v577_v6 = vmul.f32 %v563_v34, %v2415_v2  ;;  %v578_v0 = vmul.f32 %v563_v34, %v2420_v4  ;;  %v1989_v2 = vld [vmem:[%s3257_s4 + $0x8] sm:$0xff]  ;;  %v1990_v4 = vld [vmem:[%s3257_s4 + $0x10] sm:$0xff] }
 0x1cf   : > { %729 = vmatpush.bf16.msra.mxu2 %v613_v35  ;;  %768 = vmatpush.bf16.msra.mxu3 %v614_v36 }
 0x1d0   : > { %v638_v49 = vpop.permute.xlu0 %637  ;;  %v628_v52 = vpop.permute.xlu2 %627 }
 0x1d4   : > { %v591_v40 = vpop.permute.xlu1 %590 }
 0x1d5   : > { %v605_v43 = vadd.f32 %v591_v40, %v577_v6  ;;  %v606_v44 = vadd.f32 %v591_v40, %v578_v0 }
 0x1d7   : > { %v611_v45 = vpack.c.bf16 %v605_v43, %v603_v1  ;;  %v612_v46 = vpack.c.bf16 %v606_v44, %v604_v41 }
 0x1d8   : > { %v2606_v51 = vpop.permute.xlu0 %652  ;;  %v623_v59 = vpop.permute.xlu2 %622 }
 0x1d9   : > { %730 = vmatpush.bf16.msra.mxu2 %v611_v45  ;;  %769 = vmatpush.bf16.msra.mxu3 %v612_v46 }
 0x1dc   : > { %1878 = vmatmul.msk.bf16.vlgmr.msra.gmra.mxu2 %vm376_vm0, %v1988_v47  ;;  %1884 = vmatmul.msk.bf16.vlgmr.msra.gmra.mxu3 %vm376_vm0, %v1988_v47  ;;  %v648_v42 = vpop.permute.xlu1 %647 }
 0x1e0   : > { %v618_v53 = vpop.permute.xlu0 %617 }
 0x1e4   : > { %v633_v11 = vpop.permute.xlu1 %632 }
 0x1ec   : > { %1879 = vmatmul.msk.bf16.gmra.mxu2 %vm376_vm0, %v1989_v2  ;;  %1885 = vmatmul.msk.bf16.gmra.mxu3 %vm376_vm0, %v1989_v2 }
 0x1fc   : > { %1880 = vmatmul.msk.bf16.gmra.mxu2 %vm376_vm0, %v1990_v4  ;;  %1886 = vmatmul.msk.bf16.gmra.mxu3 %vm376_vm0, %v1990_v4 }
 0x20c   : > { %1881 = vmatmul.msk.bf16.gmra.mxu2 %vm376_vm0, %v1991_v14  ;;  %1887 = vmatmul.msk.bf16.gmra.mxu3 %vm376_vm0, %v1991_v14 }
 0x21c   : > { %1882 = vmatmul.msk.bf16.gmra.mxu2 %vm376_vm0, %v1992_v15  ;;  %1888 = vmatmul.msk.bf16.gmra.mxu3 %vm376_vm0, %v1992_v15 }
 0x22c   : > { %1883 = vmatmul.msk.bf16.gmra.mxu2 %vm376_vm0, %v1993_v48  ;;  %1889 = vmatmul.msk.bf16.gmra.mxu3 %vm376_vm0, %v1993_v48 }
 0x25f   : > { %v732_v54 = vpop.f32.mrf.mxu2  ;;  %v771_v55 = vpop.f32.mrf.mxu3 }
 0x260   : > { %v733_v56 = vadd.f32 %v732_v54, %v618_v53  ;;  %v772_v57 = vadd.f32 %v771_v55, %v618_v53 }
 0x262   : > { %v801_v58 = vpack.c.bf16 %v772_v57, %v733_v56 }
 0x264   : > { %813 = vst [vmem:[#allocation2] sm:$0xff] %v801_v58 }
 0x267   : > { %v734_v61 = vpop.f32.mrf.mxu2  ;;  %v773_v60 = vpop.f32.mrf.mxu3 }
 0x268   : > { %v735_v62 = vadd.f32 %v734_v61, %v623_v59  ;;  %v774_v63 = vadd.f32 %v773_v60, %v623_v59 }
 0x26a   : > { %v802_v3 = vpack.c.bf16 %v774_v63, %v735_v62 }
 0x26b   : > { %v1908_v34 = vld [vmem:[#allocation2] sm:$0xf]  ;;  %v1994_v39 = vld [vmem:[#allocation2 + $0x4] sm:$0xf] }
 0x26c   : > { %814 = vst [vmem:[#allocation2 + $0x8] sm:$0xff] %v802_v3  ;;  %v663_v3 = vpop.permute.xlu2 %662 }
 0x26f   : > { %v737_v37 = vpop.f32.mrf.mxu2  ;;  %v776_v7 = vpop.f32.mrf.mxu3 }
 0x270   : > { %v738_v8 = vadd.f32 %v737_v37, %v628_v52  ;;  %v777_v9 = vadd.f32 %v776_v7, %v628_v52  ;;  %v658_v52 = vpop.permute.xlu0 %657 }
 0x272   : > { %v803_v10 = vpack.c.bf16 %v777_v9, %v738_v8 }
 0x273   : > { %v1995_v30 = vld [vmem:[#allocation2 + $0x4] sm:$0xf0]  ;;  %v1910_v31 = vld [vmem:[#allocation2 + $0x8] sm:$0xf0] }
 0x274   : > { %815 = vst [vmem:[#allocation2 + $0x10] sm:$0xff] %v803_v10  ;;  %v1909_v38 = vor.u32 %v1995_v30, %v1908_v34  ;;  %v1913_v5 = vor.u32 %v1994_v39, %v1910_v31 }
 0x277   : > { %v739_v12 = vpop.f32.mrf.mxu2  ;;  %v778_v13 = vpop.f32.mrf.mxu3 }
 0x278   : > { %v740_v16 = vadd.f32 %v739_v12, %v633_v11  ;;  %v779_v17 = vadd.f32 %v778_v13, %v633_v11  ;;  %v668_v9 = vpop.permute.xlu0 %667 }
 0x27a   : > { %v804_v18 = vpack.c.bf16 %v779_v17, %v740_v16  ;;  %v673_v17 = vpop.permute.xlu2 %672 }
 0x27b   : > { %v1916_v24 = vld [vmem:[#allocation2 + $0x10] sm:$0xf]  ;;  %v1996_v26 = vld [vmem:[#allocation2 + $0x14] sm:$0xf] }
 0x27c   : > { %816 = vst [vmem:[#allocation2 + $0x18] sm:$0xff] %v804_v18 }
 0x27f   : > { %v742_v19 = vpop.f32.mrf.mxu2  ;;  %v781_v20 = vpop.f32.mrf.mxu3 }
 0x280   : > { %v743_v21 = vadd.f32 %v742_v19, %v638_v49  ;;  %v782_v22 = vadd.f32 %v781_v20, %v638_v49 }
 0x282   : > { %v805_v23 = vpack.c.bf16 %v782_v22, %v743_v21 }
 0x283   : > { %v1997_v25 = vld [vmem:[#allocation2 + $0x14] sm:$0xf0]  ;;  %v1918_v27 = vld [vmem:[#allocation2 + $0x18] sm:$0xf0] }
 0x284   : > { %817 = vst [vmem:[#allocation3] sm:$0xff] %v805_v23  ;;  %v1917_v28 = vor.u32 %v1997_v25, %v1916_v24  ;;  %v1921_v29 = vor.u32 %v1996_v26, %v1918_v27 }
 0x286   : > { %961 = vmatpush.bf16.msrb.mxu0 %v1917_v28  ;;  %2009 = vmatpush.bf16.msrb.mxu2 %v1917_v28 }
 0x287   : > { %1050 = vmatpush.bf16.msrb.mxu1 %v1921_v29  ;;  %2011 = vmatpush.bf16.msrb.mxu3 %v1921_v29  ;;  %v744_v32 = vpop.f32.mrf.mxu2  ;;  %v783_v33 = vpop.f32.mrf.mxu3 }
 0x288   : > { %v745_v35 = vadd.f32 %v744_v32, %v643_v50  ;;  %v784_v36 = vadd.f32 %v783_v33, %v643_v50 }
 0x28a   : > { %v806_v6 = vpack.c.bf16 %v784_v36, %v745_v35  ;;  %962 = vmatpush.bf16.msrb.mxu0 %v1909_v38  ;;  %2010 = vmatpush.bf16.msrb.mxu2 %v1909_v38 }
 0x28b   : > { %1051 = vmatpush.bf16.msrb.mxu1 %v1913_v5  ;;  %2012 = vmatpush.bf16.msrb.mxu3 %v1913_v5  ;;  %v1998_v44 = vld [vmem:[#allocation3 + $0x4] sm:$0xf]  ;;  %v1892_v45 = vld [vmem:[#allocation3] sm:$0xf] }
 0x28c   : > { %818 = vst [vmem:[#allocation3 + $0x8] sm:$0xff] %v806_v6 }
 0x28f   : > { %v747_v0 = vpop.f32.mrf.mxu2  ;;  %v786_v40 = vpop.f32.mrf.mxu3 }
 0x290   : > { %v748_v1 = vadd.f32 %v747_v0, %v648_v42  ;;  %v787_v41 = vadd.f32 %v786_v40, %v648_v42 }
 0x292   : > { %v807_v43 = vpack.c.bf16 %v787_v41, %v748_v1 }
 0x293   : > { %v1894_v46 = vld [vmem:[#allocation3 + $0x8] sm:$0xf0]  ;;  %v1999_v47 = vld [vmem:[#allocation3 + $0x4] sm:$0xf0] }
 0x294   : > { %819 = vst [vmem:[#allocation3 + $0x10] sm:$0xff] %v807_v43  ;;  %v1893_v2 = vor.u32 %v1999_v47, %v1892_v45  ;;  %v1897_v4 = vor.u32 %v1998_v44, %v1894_v46 }
 0x296   : > { %862 = vxpose.binary.xlu1.c.b16.start [1/4] (short) %v1897_v4, %v1893_v2, 128 }
 0x297   : > { %v749_v14 = vpop.f32.mrf.mxu2  ;;  %v788_v15 = vpop.f32.mrf.mxu3 }
 0x298   : > { %v750_v48 = vadd.f32 %v749_v14, %v2606_v51  ;;  %v789_v49 = vadd.f32 %v788_v15, %v2606_v51 }
 0x29a   : > { %v808_v50 = vpack.c.bf16 %v789_v49, %v750_v48 }
 0x29b   : > { %v2000_v58 = vld [vmem:[#allocation3 + $0x14] sm:$0xf]  ;;  %v1900_v59 = vld [vmem:[#allocation3 + $0x10] sm:$0xf] }
 0x29c   : > { %820 = vst [vmem:[#allocation3 + $0x18] sm:$0xff] %v808_v50 }
 0x29f   : > { %v752_v53 = vpop.f32.mrf.mxu2  ;;  %v791_v54 = vpop.f32.mrf.mxu3 }
 0x2a0   : > { %v753_v55 = vadd.f32 %v752_v53, %v658_v52  ;;  %v792_v56 = vadd.f32 %v791_v54, %v658_v52 }
 0x2a2   : > { %v809_v57 = vpack.c.bf16 %v792_v56, %v753_v55 }
 0x2a3   : > { %v1902_v61 = vld [vmem:[#allocation3 + $0x18] sm:$0xf0]  ;;  %v2001_v60 = vld [vmem:[#allocation3 + $0x14] sm:$0xf0] }
 0x2a4   : > { %821 = vst [vmem:[#allocation4] sm:$0xff] %v809_v57  ;;  %v1901_v62 = vor.u32 %v2001_v60, %v1900_v59  ;;  %v1905_v63 = vor.u32 %v2000_v58, %v1902_v61 }
 0x2a6   : > { %863 = vxpose.binary.xlu1.c.b16.end [2/4] (short) %v1905_v63, %v1901_v62, 128 }
 0x2a7   : > { %v754_v42 = vpop.f32.mrf.mxu2  ;;  %v793_v37 = vpop.f32.mrf.mxu3 }
 0x2a8   : > { %v755_v51 = vadd.f32 %v754_v42, %v663_v3  ;;  %v794_v7 = vadd.f32 %v793_v37, %v663_v3 }
 0x2aa   : > { %v810_v8 = vpack.c.bf16 %v794_v7, %v755_v51 }
 0x2ac   : > { %822 = vst [vmem:[#allocation4 + $0x8] sm:$0xff] %v810_v8 }
 0x2af   : > { %v757_v10 = vpop.f32.mrf.mxu2  ;;  %v796_v11 = vpop.f32.mrf.mxu3 }
 0x2b0   : > { %v758_v12 = vadd.f32 %v757_v10, %v668_v9  ;;  %v797_v13 = vadd.f32 %v796_v11, %v668_v9 }
 0x2b2   : > { %v811_v16 = vpack.c.bf16 %v797_v13, %v758_v12 }
 0x2b4   : > { %823 = vst [vmem:[#allocation4 + $0x10] sm:$0xff] %v811_v16 }
 0x2b7   : > { %v759_v18 = vpop.f32.mrf.mxu2  ;;  %v798_v19 = vpop.f32.mrf.mxu3 }
 0x2b8   : > { %v760_v20 = vadd.f32 %v759_v18, %v673_v17  ;;  %v799_v21 = vadd.f32 %v798_v19, %v673_v17 }
 0x2ba   : > { %v812_v22 = vpack.c.bf16 %v799_v21, %v760_v20 }
 0x2bc   : > { %824 = vst [vmem:[#allocation4 + $0x18] sm:$0xff] %v812_v22 }
 0x342   : > { %v870_v23 = vpop.trf.xlu1 }
 0x343   : > { %1922 = vmatmul.msk.bf16.vlgmr.msrb.gmra.mxu0 %vm376_vm0, %v870_v23  ;;  %1938 = vmatmul.msk.bf16.vlgmr.msrb.gmra.mxu1 %vm376_vm0, %v870_v23 }
 0x34a   : > { %v871_v24 = vpop.trf.xlu1 }
 0x352   : > { %v872_v25 = vpop.trf.xlu1 }
 0x353   : > { %1923 = vmatmul.msk.bf16.gmra.mxu0 %vm376_vm0, %v872_v25  ;;  %1939 = vmatmul.msk.bf16.gmra.mxu1 %vm376_vm0, %v872_v25 }
 0x35a   : > { %v873_v26 = vpop.trf.xlu1 }
 0x362   : > { %v874_v27 = vpop.trf.xlu1 }
 0x363   : > { %1924 = vmatmul.msk.bf16.gmra.mxu0 %vm376_vm0, %v874_v27  ;;  %1940 = vmatmul.msk.bf16.gmra.mxu1 %vm376_vm0, %v874_v27 }
 0x36a   : > { %v875_v28 = vpop.trf.xlu1 }
 0x372   : > { %v876_v29 = vpop.trf.xlu1 }
 0x373   : > { %1925 = vmatmul.msk.bf16.gmra.mxu0 %vm376_vm0, %v876_v29  ;;  %1941 = vmatmul.msk.bf16.gmra.mxu1 %vm376_vm0, %v876_v29 }
 0x37a   : > { %v877_v30 = vpop.trf.xlu1 }
 0x382   : > { %v878_v31 = vpop.trf.xlu1 }
 0x383   : > { %1926 = vmatmul.msk.bf16.gmra.mxu0 %vm376_vm0, %v878_v31  ;;  %1942 = vmatmul.msk.bf16.gmra.mxu1 %vm376_vm0, %v878_v31 }
 0x38a   : > { %v879_v32 = vpop.trf.xlu1 }
 0x392   : > { %v880_v33 = vpop.trf.xlu1 }
 0x393   : > { %1927 = vmatmul.msk.bf16.gmra.mxu0 %vm376_vm0, %v880_v33  ;;  %1943 = vmatmul.msk.bf16.gmra.mxu1 %vm376_vm0, %v880_v33 }
 0x39a   : > { %v881_v34 = vpop.trf.xlu1 }
 0x39b   : > { %1935 = vmatmul.msk.bf16.vlgmr.msrb.gmra.mxu2 %vm376_vm0, %v881_v34  ;;  %1951 = vmatmul.msk.bf16.vlgmr.msrb.gmra.mxu3 %vm376_vm0, %v881_v34 }
 0x3a2   : > { %v882_v35 = vpop.trf.xlu1 }
 0x3a3   : > { %1928 = vmatmul.msk.bf16.gmra.mxu0 %vm376_vm0, %v882_v35  ;;  %1944 = vmatmul.msk.bf16.gmra.mxu1 %vm376_vm0, %v882_v35 }
 0x3aa   : > { %v883_v36 = vpop.trf.xlu1 }
 0x3ab   : > { %1936 = vmatmul.msk.bf16.gmra.mxu2 %vm376_vm0, %v883_v36  ;;  %1952 = vmatmul.msk.bf16.gmra.mxu3 %vm376_vm0, %v883_v36 }
 0x3b2   : > { %v884_v38 = vpop.trf.xlu1 }
 0x3b3   : > { %1929 = vmatmul.msk.bf16.gmra.mxu0 %vm376_vm0, %v884_v38  ;;  %1945 = vmatmul.msk.bf16.gmra.mxu1 %vm376_vm0, %v884_v38 }
 0x3ba   : > { %v885_v44 = vpop.trf.xlu1 }
 0x3bb   : > { %1937 = vmatmul.msk.bf16.gmra.mxu2 %vm376_vm0, %v885_v44  ;;  %1953 = vmatmul.msk.bf16.gmra.mxu3 %vm376_vm0, %v885_v44 }
 0x3c0   : > { %v2630_v39 = vpop.f32.mrf.mxu0  ;;  %v2632_v5 = vpop.f32.mrf.mxu1 }
 0x3c3   : > { %1930 = vmatmul.msk.bf16.gmra.mxu0 %vm376_vm0, %v871_v24  ;;  %1946 = vmatmul.msk.bf16.gmra.mxu1 %vm376_vm0, %v871_v24 }
 0x3c8   : > { %v2636_v6 = vpop.f32.mrf.mxu0  ;;  %v2638_v0 = vpop.f32.mrf.mxu1 }
 0x3c9   : > { %3285 = vst [vmem:[#allocation8_spill] sm:$0xff] %v2638_v0 }
 0x3d0   : > { %v2640_v40 = vpop.f32.mrf.mxu0  ;;  %v2642_v1 = vpop.f32.mrf.mxu1 }
 0x3d1   : > { %3286 = vst [vmem:[#allocation9_spill] sm:$0xff] %v2642_v1  ;;  %v1133_v21 = vmax.f32 %v2630_v39, %v2640_v40 }
 0x3d3   : > { %1931 = vmatmul.msk.bf16.gmra.mxu0 %vm376_vm0, %v873_v26  ;;  %1947 = vmatmul.msk.bf16.gmra.mxu1 %vm376_vm0, %v873_v26 }
 0x3d8   : > { %v2646_v41 = vpop.f32.mrf.mxu0  ;;  %v2648_v43 = vpop.f32.mrf.mxu1 }
 0x3d9   : > { %3287 = vst [vmem:[#allocation10_spill] sm:$0xff] %v2648_v43 }
 0x3e0   : > { %v2652_v45 = vpop.f32.mrf.mxu0  ;;  %v2654_v46 = vpop.f32.mrf.mxu1 }
 0x3e1   : > { %3288 = vst [vmem:[#allocation11_spill] sm:$0xff] %v2654_v46  ;;  %v1135_v23 = vmax.f32 %v1133_v21, %v2652_v45 }
 0x3e3   : > { %1932 = vmatmul.msk.bf16.gmra.mxu0 %vm376_vm0, %v875_v28  ;;  %1948 = vmatmul.msk.bf16.gmra.mxu1 %vm376_vm0, %v875_v28  ;;  %v1134_v28 = vmax.f32 %v2636_v6, %v2646_v41 }
 0x3e8   : > { %v2658_v47 = vpop.f32.mrf.mxu0  ;;  %v2660_v2 = vpop.f32.mrf.mxu1 }
 0x3e9   : > { %3289 = vst [vmem:[#allocation12_spill] sm:$0xff] %v2660_v2 }
 0x3f0   : > { %v2662_v4 = vpop.f32.mrf.mxu0  ;;  %v2664_v14 = vpop.f32.mrf.mxu1 }
 0x3f1   : > { %v1137_v25 = vmax.f32 %v1135_v23, %v2662_v4 }
 0x3f3   : > { %1933 = vmatmul.msk.bf16.gmra.mxu0 %vm376_vm0, %v877_v30  ;;  %1949 = vmatmul.msk.bf16.gmra.mxu1 %vm376_vm0, %v877_v30  ;;  %v1136_v30 = vmax.f32 %v1134_v28, %v2658_v47 }
 0x3f8   : > { %v2668_v15 = vpop.f32.mrf.mxu0  ;;  %v2670_v48 = vpop.f32.mrf.mxu1 }
 0x3f9   : > { %3290 = vst [vmem:[#allocation13_spill] sm:$0xff] %v2670_v48 }
 0x400   : > { %v2672_v49 = vpop.f32.mrf.mxu0  ;;  %v2674_v50 = vpop.f32.mrf.mxu1 }
 0x401   : > { %v1139_v29 = vmax.f32 %v1137_v25, %v2672_v49  ;;  %v1171_v25 = vmax.f32 %v2638_v0, %v2648_v43 }
 0x403   : > { %1934 = vmatmul.msk.bf16.gmra.mxu0 %vm376_vm0, %v879_v32  ;;  %1950 = vmatmul.msk.bf16.gmra.mxu1 %vm376_vm0, %v879_v32  ;;  %v1138_v32 = vmax.f32 %v1136_v30, %v2668_v15 }
 0x408   : > { %v2678_v52 = vpop.f32.mrf.mxu0  ;;  %v2680_v53 = vpop.f32.mrf.mxu1 }
 0x409   : > { %3291 = vst [vmem:[#allocation14_spill] sm:$0xff] %v2680_v53  ;;  %v1140_v36 = vmax.f32 %v1138_v32, %v2678_v52  ;;  %v1173_v32 = vmax.f32 %v1171_v25, %v2660_v2 }
 0x410   : > { %v2682_v54 = vpop.f32.mrf.mxu0  ;;  %v2684_v55 = vpop.f32.mrf.mxu1 }
 0x411   : > { %v1141_v31 = vmax.f32 %v1139_v29, %v2682_v54 }
 0x418   : > { %v2686_v56 = vpop.f32.mrf.mxu0  ;;  %v2688_v57 = vpop.f32.mrf.mxu1 }
 0x419   : > { %3292 = vst [vmem:[#allocation15_spill] sm:$0xff] %v2688_v57  ;;  %v1142_v44 = vmax.f32 %v1140_v36, %v2686_v56 }
 0x41e   : > { %v2722_v13 = vpop.f32.mrf.mxu2  ;;  %v2736_v22 = vpop.f32.mrf.mxu3 }
 0x420   : > { %v2690_v58 = vpop.f32.mrf.mxu0  ;;  %v2692_v59 = vpop.f32.mrf.mxu1 }
 0x421   : > { %v1143_v33 = vmax.f32 %v1141_v31, %v2690_v58  ;;  %v1170_v31 = vmax.f32 %v2632_v5, %v2642_v1 }
 0x426   : > { %v2728_v18 = vpop.f32.mrf.mxu2  ;;  %v2753_v34 = vpop.f32.mrf.mxu3 }
 0x428   : > { %v2694_v61 = vpop.f32.mrf.mxu0  ;;  %v2696_v60 = vpop.f32.mrf.mxu1 }
 0x429   : > { %v1144_v29 = vmax.f32 %v1142_v44, %v2694_v61 }
 0x42e   : > { %v2744_v27 = vpop.f32.mrf.mxu2  ;;  %v2778_v0 = vpop.f32.mrf.mxu3 }
 0x430   : > { %v2698_v62 = vpop.f32.mrf.mxu0  ;;  %v2700_v63 = vpop.f32.mrf.mxu1 }
 0x431   : > { %v1145_v38 = vmax.f32 %v1143_v33, %v2698_v62 }
 0x436   : > { %v2765_v28 = vpop.f32.mrf.mxu2 }
 0x438   : > { %v2702_v3 = vpop.f32.mrf.mxu0  ;;  %v2704_v42 = vpop.f32.mrf.mxu1 }
 0x439   : > { %3293 = vst [vmem:[#allocation16_spill] sm:$0xff] %v2704_v42  ;;  %v1146_v33 = vmax.f32 %v1144_v29, %v2702_v3 }
 0x440   : > { %v2706_v37 = vpop.f32.mrf.mxu0  ;;  %v2708_v51 = vpop.f32.mrf.mxu1 }
 0x441   : > { %3294 = vst [vmem:[#allocation17_spill] sm:$0xff] %v2706_v37  ;;  %v1147_v21 = vmax.f32 %v1145_v38, %v2706_v37  ;;  %v1172_v38 = vmax.f32 %v1170_v31, %v2654_v46  ;;  %v1175_v37 = vmax.f32 %v1173_v32, %v2670_v48  ;;  %v2788_v48 = vpop.f32.mrf.mxu2 }
 0x442   : > { %3295 = vst [vmem:[#allocation18_spill] sm:$0xff] %v2708_v51 }
 0x443   : > { %v1174_v1 = vmax.f32 %v1172_v38, %v2664_v14  ;;  %v1177_v25 = vmax.f32 %v1175_v37, %v2680_v53  ;;  %v2804_v53 = vpop.f32.mrf.mxu3 }
 0x445   : > { %v1176_v31 = vmax.f32 %v1174_v1, %v2674_v50  ;;  %v1179_v32 = vmax.f32 %v1177_v25, %v2688_v57 }
 0x448   : > { %v2710_v7 = vpop.f32.mrf.mxu0  ;;  %v2712_v8 = vpop.f32.mrf.mxu1 }
 0x449   : > { %3296 = vst [vmem:[#allocation19_spill] sm:$0xff] %v2712_v8  ;;  %v1148_v44 = vmax.f32 %v1146_v33, %v2710_v7  ;;  %v1178_v33 = vmax.f32 %v1176_v31, %v2684_v55 }
 0x450   : > { %v2714_v9 = vpop.f32.mrf.mxu0  ;;  %v2716_v10 = vpop.f32.mrf.mxu1 }
 0x451   : > { %3297 = vst [vmem:[#allocation20_spill] sm:$0xff] %v2716_v10  ;;  %v1149_v30 = vmax.f32 %v1147_v21, %v2714_v9 }
 0x458   : > { %v2718_v11 = vpop.f32.mrf.mxu0  ;;  %v2720_v12 = vpop.f32.mrf.mxu1 }
 0x459   : > { %3298 = vst [vmem:[#allocation21_spill] sm:$0xff] %v2720_v12  ;;  %v1150_v29 = vmax.f32 %v1148_v44, %v2718_v11  ;;  %v1180_v44 = vmax.f32 %v1178_v33, %v2692_v59 }
 0x460   : > { %v2724_v16 = vpop.f32.mrf.mxu0  ;;  %v2726_v17 = vpop.f32.mrf.mxu1 }
 0x461   : > { %v1151_v36 = vmax.f32 %v1149_v30, %v2724_v16 }
 0x468   : > { %v2730_v19 = vpop.f32.mrf.mxu0  ;;  %v2732_v20 = vpop.f32.mrf.mxu1 }
 0x469   : > { %3299 = vst [vmem:[#allocation22_spill] sm:$0xff] %v2732_v20  ;;  %v1152_v2 = vmax.f32 %v1150_v29, %v2730_v19  ;;  %v1182_v29 = vmax.f32 %v1180_v44, %v2700_v63 }
 0x470   : > { %v2739_v24 = vpop.f32.mrf.mxu0  ;;  %v2742_v26 = vpop.f32.mrf.mxu1 }
 0x471   : > { %v1153_v21 = vmax.f32 %v1151_v36, %v2739_v24  ;;  %v1181_v36 = vmax.f32 %v1179_v32, %v2696_v60 }
 0x473   : > { %v1183_v1 = vmax.f32 %v1181_v36, %v2704_v42  ;;  %v2813_v42 = vpop.f32.mrf.mxu2 }
 0x475   : > { %v1185_v57 = vmax.f32 %v1183_v1, %v2712_v8 }
 0x477   : > { %v1187_v32 = vmax.f32 %v1185_v57, %v2720_v12 }
 0x478   : > { %v2755_v35 = vpop.f32.mrf.mxu0  ;;  %v2761_v23 = vpop.f32.mrf.mxu1 }
 0x479   : > { %3300 = vst [vmem:[#allocation23_spill] sm:$0xff] %v2761_v23  ;;  %v1154_v37 = vmax.f32 %v1152_v2, %v2755_v35 }
 0x480   : > { %v2776_v43 = vpop.f32.mrf.mxu0  ;;  %v2791_v46 = vpop.f32.mrf.mxu1 }
 0x481   : > { %v1155_v30 = vmax.f32 %v1153_v21, %v2776_v43 }
 0x483   : > { %v1157_v38 = vmax.f32 %v1155_v30, %v2722_v13  ;;  %v1184_v30 = vmax.f32 %v1182_v29, %v2708_v51 }
 0x485   : > { %v1159_v31 = vmax.f32 %v1157_v38, %v2744_v27  ;;  %v1186_v36 = vmax.f32 %v1184_v30, %v2716_v10  ;;  %v2823_v30 = vpop.f32.mrf.mxu3 }
 0x487   : > { %v1161_v44 = vmax.f32 %v1159_v31, %v2788_v48  ;;  %v1188_v38 = vmax.f32 %v1186_v36, %v2726_v17 }
 0x488   : > { %v2799_v21 = vpop.f32.mrf.mxu0  ;;  %v2817_v8 = vpop.f32.mrf.mxu1 }
 0x489   : > { %v1156_v25 = vmax.f32 %v1154_v37, %v2799_v21  ;;  %v1189_v37 = vmax.f32 %v1187_v32, %v2732_v20  ;;  %v1190_v57 = vmax.f32 %v1188_v38, %v2742_v26 }
 0x48b   : > { %v1158_v2 = vmax.f32 %v1156_v25, %v2728_v18  ;;  %v1191_v25 = vmax.f32 %v1189_v37, %v2761_v23  ;;  %v1192_v20 = vmax.f32 %v1190_v57, %v2791_v46 }
 0x48d   : > { %v1160_v33 = vmax.f32 %v1158_v2, %v2765_v28  ;;  %v1193_v2 = vmax.f32 %v1191_v25, %v2817_v8  ;;  %v1194_v10 = vmax.f32 %v1192_v20, %v2736_v22 }
 0x48f   : > { %v1162_v1 = vmax.f32 %v1160_v33, %v2813_v42  ;;  %v1195_v31 = vmax.f32 %v1193_v2, %v2753_v34 }
 0x491   : > { %v1163_v29 = vmax.f32 %v1161_v44, %v1162_v1  ;;  %v1197_v36 = vmax.f32 %v1195_v31, %v2804_v53  ;;  %v1196_v44 = vmax.f32 %v1194_v10, %v2778_v0  ;;  %v2830_v1 = vpop.f32.mrf.mxu3 }
 0x493   : > { %v1164_v32 = vrot.slane %v1163_v29, 4  ;;  %v1199_v25 = vmax.f32 %v1197_v36, %v2830_v1  ;;  %v1198_v23 = vmax.f32 %v1196_v44, %v2823_v30 }
 0x495   : > { %v1165_v12 = vmax.f32 %v1163_v29, %v1164_v32  ;;  %v1200_v29 = vmax.f32 %v1198_v23, %v1199_v25 }
 0x497   : > { %v1166_v33 = vrot.slane %v1165_v12, 2  ;;  %v1201_v10 = vrot.slane %v1200_v29, 4 }
 0x499   : > { %v1167_v51 = vmax.f32 %v1165_v12, %v1166_v33  ;;  %v1202_v23 = vmax.f32 %v1200_v29, %v1201_v10 }
 0x49b   : > { %v1168_v37 = vrot.slane %v1167_v51, 1  ;;  %v1203_v44 = vrot.slane %v1202_v23, 2 }
 0x49d   : > { %v1169_v38 = vmax.f32 %v1167_v51, %v1168_v37 }
 0x49f   : > { %v2834_v57 = vmax.f32 %v1169_v38, -1e+30 }
 0x4a1   : > { %3301 = vst [vmem:[#allocation24_spill] sm:$0xff] %v2834_v57  ;;  %v1215_v2 = vsub.f32 %v2630_v39, %v2834_v57  ;;  %v1217_v12 = vsub.f32 %v2636_v6, %v2834_v57  ;;  %v1219_v20 = vsub.f32 %v2640_v40, %v2834_v57  ;;  %v1221_v51 = vsub.f32 %v2646_v41, %v2834_v57 }
 0x4a2   : > { %v1223_v33 = vsub.f32 %v2652_v45, %v2834_v57  ;;  %v1225_v39 = vsub.f32 %v2658_v47, %v2834_v57  ;;  %v1227_v40 = vsub.f32 %v2662_v4, %v2834_v57  ;;  %v1229_v41 = vsub.f32 %v2668_v15, %v2834_v57 }
 0x4a3   : > { %v1279_v32 = vmul.f32 1.442695, %v1215_v2  ;;  %v1283_v31 = vmul.f32 1.442695, %v1217_v12  ;;  %v1287_v36 = vmul.f32 1.442695, %v1219_v20  ;;  %v1231_v45 = vsub.f32 %v2672_v49, %v2834_v57 }
 0x4a4   : > { %v1291_v6 = vmul.f32 1.442695, %v1221_v51  ;;  %v1295_v37 = vmul.f32 1.442695, %v1223_v33  ;;  %v1299_v38 = vmul.f32 1.442695, %v1225_v39  ;;  %v1233_v47 = vsub.f32 %v2678_v52, %v2834_v57 }
 0x4a5   : > { %2082 = vpow2.f32 %v1279_v32  ;;  %v1235_v4 = vsub.f32 %v2682_v54, %v2834_v57  ;;  %v1303_v2 = vmul.f32 1.442695, %v1227_v40  ;;  %v1204_v12 = vmax.f32 %v1202_v23, %v1203_v44 }
 0x4a6   : > { %2084 = vpow2.f32 %v1283_v31  ;;  %v1237_v15 = vsub.f32 %v2686_v56, %v2834_v57  ;;  %v1307_v20 = vmul.f32 1.442695, %v1229_v41  ;;  %v1239_v52 = vsub.f32 %v2690_v58, %v2834_v57 }
 0x4a7   : > { %2086 = vpow2.f32 %v1287_v36  ;;  %v1311_v51 = vmul.f32 1.442695, %v1231_v45  ;;  %v1241_v54 = vsub.f32 %v2694_v61, %v2834_v57  ;;  %v1315_v32 = vmul.f32 1.442695, %v1233_v47  ;;  %v3302_v61 = vld [vmem:[#allocation17_spill] sm:$0xff] }
 0x4a8   : > { %2088 = vpow2.f32 %v1291_v6  ;;  %v1243_v56 = vsub.f32 %v2698_v62, %v2834_v57  ;;  %v1319_v36 = vmul.f32 1.442695, %v1235_v4  ;;  %v1205_v23 = vrot.slane %v1204_v12, 1 }
 0x4a9   : > { %2090 = vpow2.f32 %v1295_v37  ;;  %v1245_v39 = vsub.f32 %v2702_v3, %v2834_v57  ;;  %v1323_v58 = vmul.f32 1.442695, %v1237_v15  ;;  %v1247_v37 = vsub.f32 %v3302_v61, %v2834_v57 }
 0x4aa   : > { %2092 = vpow2.f32 %v1299_v38  ;;  %v1327_v44 = vmul.f32 1.442695, %v1239_v52  ;;  %v1249_v62 = vsub.f32 %v2710_v7, %v2834_v57  ;;  %v1331_v41 = vmul.f32 1.442695, %v1241_v54 }
 0x4ab   : > { %v2854_v25 = vpop.eup %2082  ;;  %2094 = vpow2.f32 %v1303_v2  ;;  %v1251_v3 = vsub.f32 %v2714_v9, %v2834_v57  ;;  %v1253_v47 = vsub.f32 %v2718_v11, %v2834_v57  ;;  %v1335_v4 = vmul.f32 1.442695, %v1243_v56 }
 0x4ac   : > { %v2858_v29 = vpop.eup %2084  ;;  %2096 = vpow2.f32 %v1307_v20  ;;  %v1339_v2 = vmul.f32 1.442695, %v1245_v39  ;;  %v1206_v20 = vmax.f32 %v1204_v12, %v1205_v23  ;;  %v1343_v52 = vmul.f32 1.442695, %v1247_v37 }
 0x4ad   : > { %v1409_v49 = vadd.f32 %v2858_v29, %v2854_v25  ;;  %v2866_v10 = vpop.eup %2086  ;;  %2098 = vpow2.f32 %v1311_v51  ;;  %v1257_v9 = vsub.f32 %v2730_v19, %v2834_v57  ;;  %v1347_v11 = vmul.f32 1.442695, %v1249_v62 }
 0x4ae   : > { %v2873_v33 = vpop.eup %2088  ;;  %2100 = vpow2.f32 %v1315_v32  ;;  %v1259_v12 = vsub.f32 %v2739_v24, %v2834_v57  ;;  %v2912_v23 = vmax.f32 %v1206_v20, -1e+30  ;;  %v1277_v62 = vsub.f32 %v2813_v42, %v2834_v57 }
 0x4af   : > { %v1410_v31 = vadd.f32 %v2866_v10, %v1409_v49  ;;  %v2880_v40 = vpop.eup %2090  ;;  %2102 = vpow2.f32 %v1319_v36  ;;  %v1255_v49 = vsub.f32 %v2724_v16, %v2834_v57  ;;  %v1351_v16 = vmul.f32 1.442695, %v1251_v3 }
 0x4b0   : > { %v2887_v38 = vpop.eup %2092  ;;  %2104 = vpow2.f32 %v1323_v58  ;;  %v1355_v36 = vmul.f32 1.442695, %v1253_v47  ;;  %v1273_v58 = vsub.f32 %v2765_v28, %v2834_v57  ;;  %v1363_v61 = vmul.f32 1.442695, %v1257_v9 }
 0x4b1   : > { %v1411_v6 = vadd.f32 %v2873_v33, %v1410_v31  ;;  %v2894_v7 = vpop.eup %2094  ;;  %2106 = vpow2.f32 %v1327_v44  ;;  %v1271_v31 = vsub.f32 %v2744_v27, %v2834_v57  ;;  %v1359_v24 = vmul.f32 1.442695, %v1255_v49 }
 0x4b2   : > { %v2898_v51 = vpop.eup %2096  ;;  %2108 = vpow2.f32 %v1331_v41  ;;  %v1275_v27 = vsub.f32 %v2788_v48, %v2834_v57  ;;  %v1367_v41 = vmul.f32 1.442695, %v1259_v12  ;;  %v1216_v48 = vsub.f32 %v2632_v5, %v2912_v23 }
 0x4b3   : > { %v1412_v45 = vadd.f32 %v2880_v40, %v1411_v6  ;;  %v2903_v32 = vpop.eup %2098  ;;  %2110 = vpow2.f32 %v1335_v4  ;;  %v1391_v28 = vmul.f32 1.442695, %v1271_v31  ;;  %v1395_v4 = vmul.f32 1.442695, %v1273_v58 }
 0x4b4   : > { %v2909_v56 = vpop.eup %2100  ;;  %2112 = vpow2.f32 %v1339_v2  ;;  %v3303_v2 = vld [vmem:[#allocation8_spill] sm:$0xff]  ;;  %v1267_v42 = vsub.f32 %v2722_v13, %v2834_v57  ;;  %v1399_v49 = vmul.f32 1.442695, %v1275_v27  ;;  %v1403_v5 = vmul.f32 1.442695, %v1277_v62 }
 0x4b5   : > { %v1413_v15 = vadd.f32 %v2887_v38, %v1412_v45  ;;  %v2914_v39 = vpop.eup %2102  ;;  %2114 = vpow2.f32 %v1343_v52  ;;  %v1269_v31 = vsub.f32 %v2728_v18, %v2834_v57  ;;  %v1281_v13 = vmul.f32 1.442695, %v1216_v48 }
 0x4b6   : > { %v2918_v6 = vpop.eup %2104  ;;  %2116 = vpow2.f32 %v1347_v11  ;;  %v3304_v11 = vld [vmem:[#allocation9_spill] sm:$0xff] }
 0x4b7   : > { %v1414_v54 = vadd.f32 %v2894_v7, %v1413_v15  ;;  %v2923_v44 = vpop.eup %2106  ;;  %2118 = vpow2.f32 %v1351_v16  ;;  %v1218_v15 = vsub.f32 %v3303_v2, %v2912_v23  ;;  %v1387_v2 = vmul.f32 1.442695, %v1269_v31 }
 0x4b8   : > { %v2927_v45 = vpop.eup %2108  ;;  %2120 = vpow2.f32 %v1355_v36 }
 0x4b9   : > { %v1415_v19 = vadd.f32 %v2898_v51, %v1414_v54  ;;  %v2932_v47 = vpop.eup %2110  ;;  %2122 = vpow2.f32 %v1359_v24  ;;  %v1220_v54 = vsub.f32 %v3304_v11, %v2912_v23  ;;  %v1285_v24 = vmul.f32 1.442695, %v1218_v15 }
 0x4ba   : > { %v2936_v20 = vpop.eup %2112  ;;  %2124 = vpow2.f32 %v1363_v61  ;;  %v1263_v61 = vsub.f32 %v2776_v43, %v2834_v57 }
 0x4bb   : > { %v1416_v37 = vadd.f32 %v2903_v32, %v1415_v19  ;;  %v2941_v9 = vpop.eup %2114  ;;  %2126 = vpow2.f32 %v1367_v41  ;;  %v3305_v19 = vld [vmem:[#allocation10_spill] sm:$0xff]  ;;  %v3306_v41 = vld [vmem:[#allocation11_spill] sm:$0xff] }
 0x4bc   : > { %v2945_v12 = vpop.eup %2116  ;;  %2128 = vpow2.f32 %v1391_v28  ;;  %v1222_v58 = vsub.f32 %v3305_v19, %v2912_v23  ;;  %v1224_v28 = vsub.f32 %v3306_v41, %v2912_v23  ;;  %v1375_v11 = vmul.f32 1.442695, %v1263_v61 }
 0x4bd   : > { %v1417_v3 = vadd.f32 %v2909_v56, %v1416_v37  ;;  %v2950_v36 = vpop.eup %2118  ;;  %2130 = vpow2.f32 %v1395_v4  ;;  %v1383_v37 = vmul.f32 1.442695, %v1267_v42  ;;  %v1265_v4 = vsub.f32 %v2799_v21, %v2834_v57  ;;  %v3307_v42 = vld [vmem:[#allocation12_spill] sm:$0xff] }
 0x4be   : > { %v2954_v27 = vpop.eup %2120  ;;  %2132 = vpow2.f32 %v1399_v49  ;;  %v1226_v49 = vsub.f32 %v3307_v42, %v2912_v23  ;;  %v1228_v21 = vsub.f32 %v2664_v14, %v2912_v23  ;;  %v1297_v31 = vmul.f32 1.442695, %v1224_v28 }
 0x4bf   : > { %v1418_v52 = vadd.f32 %v2914_v39, %v1417_v3  ;;  %v2959_v62 = vpop.eup %2122  ;;  %2134 = vpow2.f32 %v1403_v5  ;;  %v1289_v3 = vmul.f32 1.442695, %v1220_v54  ;;  %v1261_v19 = vsub.f32 %v2755_v35, %v2834_v57 }
 0x4c0   : > { %v2963_v48 = vpop.eup %2124  ;;  %2136 = vpow2.f32 %v1281_v13  ;;  %v1301_v41 = vmul.f32 1.442695, %v1226_v49  ;;  %v1499_v28 = vpack.c.bf16 %v2936_v20, %v2932_v47 }
 0x4c1   : > { %v1419_v16 = vadd.f32 %v2918_v6, %v1418_v52  ;;  %v2968_v43 = vpop.eup %2126  ;;  %2138 = vpow2.f32 %v1285_v24  ;;  %v1293_v52 = vmul.f32 1.442695, %v1222_v58  ;;  %v1379_v24 = vmul.f32 1.442695, %v1265_v4 }
 0x4c2   : > { %v2972_v5 = vpop.eup %2128  ;;  %2140 = vpow2.f32 %v1383_v37  ;;  %v3308_v37 = vld [vmem:[#allocation13_spill] sm:$0xff]  ;;  %v1232_v4 = vsub.f32 %v2674_v50, %v2912_v23  ;;  %v1371_v49 = vmul.f32 1.442695, %v1261_v19  ;;  %1537 = vmatpush.bf16.msra.mxu2 %v1499_v28  ;;  %v1236_v28 = vsub.f32 %v2684_v55, %v2912_v23 }
 0x4c3   : > { %v1420_v18 = vadd.f32 %v2923_v44, %v1419_v16  ;;  %v2975_v16 = vpop.eup %2130  ;;  %2142 = vpow2.f32 %v1289_v3  ;;  %v1240_v55 = vsub.f32 %v2692_v59, %v2912_v23  ;;  %v1244_v59 = vsub.f32 %v2700_v63, %v2912_v23 }
 0x4c4   : > { %v2979_v13 = vpop.eup %2132  ;;  %2144 = vpow2.f32 %v1387_v2  ;;  %v1305_v2 = vmul.f32 1.442695, %v1228_v21 }
 0x4c5   : > { %v1421_v15 = vadd.f32 %v2927_v45, %v1420_v18  ;;  %v2984_v61 = vpop.eup %2134  ;;  %v1230_v18 = vsub.f32 %v3308_v37, %v2912_v23  ;;  %2146 = vpow2.f32 %v1293_v52  ;;  %v1513_v37 = vpack.c.bf16 %v2975_v16, %v2972_v5 }
 0x4c6   : > { %2148 = vpow2.f32 %v1375_v11  ;;  %v1515_v35 = vpack.c.bf16 %v2984_v61, %v2979_v13 }
 0x4c7   : > { %v1422_v54 = vadd.f32 %v2932_v47, %v1421_v15  ;;  %v2988_v15 = vpop.eup %2136  ;;  %2150 = vpow2.f32 %v1297_v31  ;;  %v1309_v50 = vmul.f32 1.442695, %v1230_v18  ;;  %v2003_v31 = vld [vmem:[#allocation4 + $0x4] sm:$0xf0]  ;;  %v1313_v18 = vmul.f32 1.442695, %v1232_v4 }
 0x4c8   : > { %3309 = vst [vmem:[#allocation17_spill] sm:$0xff] %v2988_v15  ;;  %v2995_v3 = vpop.eup %2138  ;;  %2152 = vpow2.f32 %v1379_v24  ;;  %1556 = vmatpush.bf16.msra.mxu3 %v1515_v35 }
 0x4c9   : > { %v1423_v58 = vadd.f32 %v2936_v20, %v1422_v54  ;;  %3310 = vst [vmem:[#allocation8_spill] sm:$0xff] %v2995_v3  ;;  %v2999_v42 = vpop.eup %2140  ;;  %v1446_v11 = vadd.f32 %v2995_v3, %v2988_v15  ;;  %v3312_v20 = vld [vmem:[#allocation14_spill] sm:$0xff]  ;;  %2154 = vpow2.f32 %v1301_v41  ;;  %v1956_v41 = vld [vmem:[#allocation4] sm:$0xf] }
 0x4ca   : > { %v3004_v47 = vpop.eup %2142  ;;  %v1234_v54 = vsub.f32 %v3312_v20, %v2912_v23  ;;  %2156 = vpow2.f32 %v1305_v2  ;;  %v3314_v20 = vld [vmem:[#allocation15_spill] sm:$0xff] }
 0x4cb   : > { %v1424_v14 = vadd.f32 %v2941_v9, %v1423_v58  ;;  %3311 = vst [vmem:[#allocation9_spill] sm:$0xff] %v3004_v47  ;;  %v3008_v21 = vpop.eup %2144  ;;  %v1447_v24 = vadd.f32 %v3004_v47, %v1446_v11  ;;  %v1497_v58 = vpack.c.bf16 %v2927_v45, %v2923_v44  ;;  %2158 = vpow2.f32 %v1371_v49 }
 0x4cc   : > { %1557 = vmatpush.bf16.msra.mxu3 %v1513_v37  ;;  %v3022_v44 = vor.u32 %v2003_v31, %v1956_v41  ;;  %v1238_v3 = vsub.f32 %v3314_v20, %v2912_v23  ;;  %2160 = vpow2.f32 %v1309_v50  ;;  %v1317_v4 = vmul.f32 1.442695, %v1234_v54  ;;  %v3315_v41 = vld [vmem:[#allocation16_spill] sm:$0xff] }
 0x4cd   : > { %v1425_v52 = vadd.f32 %v2945_v12, %v1424_v14  ;;  %v3016_v14 = vpop.eup %2146  ;;  %1538 = vmatpush.bf16.msra.mxu2 %v1497_v58  ;;  %v1511_v31 = vpack.c.bf16 %v3008_v21, %v2999_v42  ;;  %v1242_v37 = vsub.f32 %v2696_v60, %v2912_v23  ;;  %2162 = vpow2.f32 %v1313_v18  ;;  %v3317_v60 = vld [vmem:[#allocation19_spill] sm:$0xff] }
 0x4ce   : > { %3313 = vst [vmem:[#allocation10_spill] sm:$0xff] %v3016_v14  ;;  %v2149_v35 = vpop.eup %2148  ;;  %v1448_v11 = vadd.f32 %v3016_v14, %v1447_v24  ;;  %v1495_v24 = vpack.c.bf16 %v2918_v6, %v2914_v39  ;;  %v1321_v54 = vmul.f32 1.442695, %v1236_v28  ;;  %v1250_v15 = vsub.f32 %v3317_v60, %v2912_v23 }
 0x4cf   : > { %v1426_v19 = vadd.f32 %v2950_v36, %v1425_v52  ;;  %v3024_v45 = vpop.eup %2150  ;;  %2164 = vpow2.f32 %v1317_v4  ;;  %v1325_v63 = vmul.f32 1.442695, %v1238_v3  ;;  %v1329_v4 = vmul.f32 1.442695, %v1240_v55 }
 0x4d0   : > { %v2153_v2 = vpop.eup %2152  ;;  %1558 = vmatpush.bf16.msra.mxu3 %v1511_v31  ;;  %2166 = vpow2.f32 %v1321_v54  ;;  %v1333_v60 = vmul.f32 1.442695, %v1242_v37  ;;  %v1491_v54 = vpack.c.bf16 %v2898_v51, %v2894_v7  ;;  %v1349_v51 = vmul.f32 1.442695, %v1250_v15 }
 0x4d1   : > { %v1427_v52 = vadd.f32 %v2954_v27, %v1426_v19  ;;  %v1449_v19 = vadd.f32 %v3024_v45, %v1448_v11  ;;  %v3036_v58 = vpop.eup %2154  ;;  %1539 = vmatpush.bf16.msra.mxu2 %v1495_v24  ;;  %v3316_v11 = vld [vmem:[#allocation18_spill] sm:$0xff]  ;;  %v1509_v24 = vpack.c.bf16 %v2153_v2, %v2149_v35  ;;  %2168 = vpow2.f32 %v1325_v63 }
 0x4d2   : > { %v3046_v6 = vpop.eup %2156  ;;  %v1248_v20 = vsub.f32 %v3316_v11, %v2912_v23  ;;  %v3319_v11 = vld [vmem:[#allocation21_spill] sm:$0xff]  ;;  %2170 = vpow2.f32 %v1329_v4  ;;  %v3320_v63 = vld [vmem:[#allocation22_spill] sm:$0xff]  ;;  %v1268_v15 = vsub.f32 %v2736_v22, %v2912_v23  ;;  %v1487_v22 = vpack.c.bf16 %v2873_v33, %v2866_v10 }
 0x4d3   : > { %v1428_v49 = vadd.f32 %v2959_v62, %v1427_v52  ;;  %v1246_v52 = vsub.f32 %v3315_v41, %v2912_v23  ;;  %v1450_v39 = vadd.f32 %v3036_v58, %v1449_v19  ;;  %v2159_v28 = vpop.eup %2158  ;;  %v1493_v19 = vpack.c.bf16 %v2909_v56, %v2903_v32  ;;  %v3318_v41 = vld [vmem:[#allocation20_spill] sm:$0xff] }
 0x4d4   : > { %v3056_v31 = vpop.eup %2160  ;;  %v1252_v57 = vsub.f32 %v3318_v41, %v2912_v23  ;;  %v1254_v14 = vsub.f32 %v3319_v11, %v2912_v23  ;;  %1559 = vmatpush.bf16.msra.mxu3 %v1509_v24  ;;  %v1276_v56 = vsub.f32 %v2823_v30, %v2912_v23  ;;  %v1337_v41 = vmul.f32 1.442695, %v1244_v59 }
 0x4d5   : > { %v1429_v50 = vadd.f32 %v2963_v48, %v1428_v49  ;;  %v1451_v49 = vadd.f32 %v3046_v6, %v1450_v39  ;;  %1540 = vmatpush.bf16.msra.mxu2 %v1493_v19  ;;  %v3065_v32 = vpop.eup %2162  ;;  %v1341_v47 = vmul.f32 1.442695, %v1246_v52  ;;  %v1507_v37 = vpack.c.bf16 %v2159_v28, %v2968_v43 }
 0x4d6   : > { %v1274_v19 = vsub.f32 %v2804_v53, %v2912_v23  ;;  %v1278_v30 = vsub.f32 %v2830_v1, %v2912_v23  ;;  %2172 = vpow2.f32 %v1333_v60  ;;  %v1345_v59 = vmul.f32 1.442695, %v1248_v20 }
 0x4d7   : > { %v1430_v18 = vadd.f32 %v2968_v43, %v1429_v50  ;;  %v1256_v50 = vsub.f32 %v2726_v17, %v2912_v23  ;;  %v1452_v39 = vadd.f32 %v3056_v31, %v1451_v49  ;;  %v1272_v49 = vsub.f32 %v2778_v0, %v2912_v23 }
 0x4d8   : > { %1560 = vmatpush.bf16.msra.mxu3 %v1507_v37  ;;  %2174 = vpow2.f32 %v1337_v41  ;;  %v1401_v43 = vmul.f32 1.442695, %v1276_v56  ;;  %v1489_v0 = vpack.c.bf16 %v2887_v38, %v2880_v40  ;;  %v1270_v24 = vsub.f32 %v2753_v34, %v2912_v23 }
 0x4d9   : > { %v1431_v3 = vadd.f32 %v2159_v28, %v1430_v18  ;;  %v1453_v55 = vadd.f32 %v3065_v32, %v1452_v39  ;;  %v3073_v18 = vpop.eup %2164  ;;  %1541 = vmatpush.bf16.msra.mxu2 %v1491_v54  ;;  %2176 = vpow2.f32 %v1341_v47  ;;  %v1258_v28 = vsub.f32 %v3320_v63, %v2912_v23  ;;  %v1958_v54 = vld [vmem:[#allocation4 + $0x8] sm:$0xf0] }
 0x4da   : > { %v3082_v7 = vpop.eup %2166  ;;  %v1405_v40 = vmul.f32 1.442695, %v1278_v30  ;;  %2178 = vpow2.f32 %v1345_v59  ;;  %v1397_v4 = vmul.f32 1.442695, %v1274_v19  ;;  %v1503_v60 = vpack.c.bf16 %v2954_v27, %v2950_v36  ;;  %v3321_v30 = vld [vmem:[#allocation23_spill] sm:$0xff] }
 0x4db   : > { %v1432_v11 = vadd.f32 %v2149_v35, %v1431_v3  ;;  %v1454_v52 = vadd.f32 %v3073_v18, %v1453_v55  ;;  %v3090_v20 = vpop.eup %2168  ;;  %2180 = vpow2.f32 %v1349_v51  ;;  %v1264_v56 = vsub.f32 %v2791_v46, %v2912_v23 }
 0x4dc   : > { %2182 = vpow2.f32 %v1401_v43  ;;  %v1357_v41 = vmul.f32 1.442695, %v1254_v14  ;;  %v1361_v36 = vmul.f32 1.442695, %v1256_v50  ;;  %v1389_v27 = vmul.f32 1.442695, %v1270_v24 }
 0x4dd   : > { %v1433_v35 = vadd.f32 %v2153_v2, %v1432_v11  ;;  %v1455_v1 = vadd.f32 %v3082_v7, %v1454_v52  ;;  %v1505_v2 = vpack.c.bf16 %v2963_v48, %v2959_v62  ;;  %1542 = vmatpush.bf16.msra.mxu2 %v1489_v0  ;;  %v3100_v62 = vpop.eup %2170  ;;  %v1353_v48 = vmul.f32 1.442695, %v1252_v57 }
 0x4de   : > { %v3104_v3 = vpop.eup %2172  ;;  %v1266_v57 = vsub.f32 %v2817_v8, %v2912_v23  ;;  %2184 = vpow2.f32 %v1405_v40  ;;  %v1385_v11 = vmul.f32 1.442695, %v1268_v15  ;;  %v1485_v46 = vpack.c.bf16 %v2858_v29, %v2854_v25 }
 0x4df   : > { %v1434_v53 = vadd.f32 %v2999_v42, %v1433_v35  ;;  %v1393_v42 = vmul.f32 1.442695, %v1272_v49  ;;  %v1456_v47 = vadd.f32 %v3090_v20, %v1455_v1  ;;  %1561 = vmatpush.bf16.msra.mxu3 %v1505_v2  ;;  %v2175_v39 = vpop.eup %2174  ;;  %v1501_v55 = vpack.c.bf16 %v2945_v12, %v2941_v9  ;;  %v2002_v9 = vld [vmem:[#allocation4 + $0x4] sm:$0xf] }
 0x4e0   : > { %v2177_v10 = vpop.eup %2176  ;;  %v1260_v17 = vsub.f32 %v2742_v26, %v2912_v23  ;;  %v1365_v50 = vmul.f32 1.442695, %v1258_v28  ;;  %v1377_v29 = vmul.f32 1.442695, %v1264_v56  ;;  %v1262_v35 = vsub.f32 %v3321_v30, %v2912_v23  ;;  %v3326_v30 = vld [vmem:[#allocation8_spill] sm:$0xff] }
 0x4e1   : > { %v1435_v38 = vadd.f32 %v3008_v21, %v1434_v53  ;;  %v1457_v21 = vadd.f32 %v3100_v62, %v1456_v47  ;;  %2186 = vpow2.f32 %v1393_v42  ;;  %1543 = vmatpush.bf16.msra.mxu2 %v1487_v22  ;;  %v3121_v8 = vpop.eup %2178  ;;  %v1500_v49 = vpack.c.bf16 %v2177_v10, %v2175_v39 }
 0x4e2   : > { %2188 = vpow2.f32 %v1397_v4  ;;  %v3126_v37 = vpop.eup %2180  ;;  %v1381_v26 = vmul.f32 1.442695, %v1266_v57  ;;  %v3139_v59 = vor.u32 %v2002_v9, %v1958_v54  ;;  %v1369_v0 = vmul.f32 1.442695, %v1260_v17  ;;  %v3323_v54 = vld [vmem:[#allocation10_spill] sm:$0xff]  ;;  %v3325_v9 = vld [vmem:[#allocation17_spill] sm:$0xff] }
 0x4e3   : > { %v1436_v34 = vadd.f32 %v2972_v5, %v1435_v38  ;;  %v1458_v5 = vadd.f32 %v3104_v3, %v1457_v21  ;;  %1562 = vmatpush.bf16.msra.mxu3 %v1503_v60  ;;  %2190 = vpow2.f32 %v1353_v48  ;;  %v3130_v19 = vpop.eup %2182  ;;  %v1498_v53 = vpack.c.bf16 %v3104_v3, %v3100_v62 }
 0x4e4   : > { %2192 = vpow2.f32 %v1357_v41  ;;  %v3135_v12 = vpop.eup %2184  ;;  %v1373_v28 = vmul.f32 1.442695, %v1262_v35  ;;  %v1496_v42 = vpack.c.bf16 %v3090_v20, %v3082_v7  ;;  %v1494_v21 = vpack.c.bf16 %v3073_v18, %v3065_v32  ;;  %v2005_v7 = vld [vmem:[#allocation4 + $0x14] sm:$0xf0]  ;;  %v1966_v20 = vld [vmem:[#allocation4 + $0x18] sm:$0xf0] }
 0x4e5   : > { %v1437_v33 = vadd.f32 %v2975_v16, %v1436_v34  ;;  %v1459_v16 = vadd.f32 %v2175_v39, %v1458_v5  ;;  %2194 = vpow2.f32 %v1385_v11  ;;  %1544 = vmatpush.bf16.msra.mxu2 %v1485_v46  ;;  %v1516_v51 = vpack.c.bf16 %v3135_v12, %v3130_v19  ;;  %v1964_v11 = vld [vmem:[#allocation4 + $0x10] sm:$0xf]  ;;  %v2004_v5 = vld [vmem:[#allocation4 + $0x14] sm:$0xf] }
 0x4e6   : > { %2196 = vpow2.f32 %v1389_v27  ;;  %v1969_v27 = vor.u32 %v2004_v5, %v1966_v20  ;;  %v1490_v46 = vpack.c.bf16 %v3036_v58, %v3024_v45  ;;  %v3324_v45 = vld [vmem:[#allocation24_spill] sm:$0xff]  ;;  %v1486_v35 = vpack.c.bf16 %v3326_v30, %v3325_v9 }
 0x4e7   : > { %v1438_v14 = vadd.f32 %v2979_v13, %v1437_v33  ;;  %v1460_v13 = vadd.f32 %v2177_v10, %v1459_v16  ;;  %1563 = vmatpush.bf16.msra.mxu3 %v1501_v55  ;;  %v3141_v52 = vpop.eup %2186  ;;  %2198 = vpow2.f32 %v1361_v36  ;;  %v1492_v10 = vpack.c.bf16 %v3056_v31, %v3046_v6  ;;  %v3322_v55 = vld [vmem:[#allocation9_spill] sm:$0xff] }
 0x4e8   : > { %v3146_v43 = vpop.eup %2188  ;;  %2200 = vpow2.f32 %v1365_v50  ;;  %1545 = vmatmul.bf16.vlgmr.msra.gmra.mxu2 %v3022_v44  ;;  %v1965_v36 = vor.u32 %v2005_v7, %v1964_v11  ;;  %v1488_v17 = vpack.c.bf16 %v3323_v54, %v3322_v55  ;;  %v1209_v58 = vsub.f32 -1e+30, %v3324_v45 }
 0x4e9   : > { %v3133_v25 = vadd.f32 %v2984_v61, %v1438_v14  ;;  %1575 = vmatpush.bf16.msrb.mxu2 %v1500_v49  ;;  %v1461_v61 = vadd.f32 %v3121_v8, %v1460_v13  ;;  %v3152_v1 = vpop.eup %2190  ;;  %2202 = vpow2.f32 %v1377_v29  ;;  %v1514_v40 = vpack.c.bf16 %v3146_v43, %v3141_v52 }
 0x4ea   : > { %1564 = vmatmul.bf16.vlgmr.msra.gmra.mxu3 %v3139_v59  ;;  %v2193_v63 = vpop.eup %2192  ;;  %2204 = vpow2.f32 %v1381_v26  ;;  %v1210_v26 = vsub.f32 -1e+30, %v2912_v23 }
 0x4eb   : > { %v1462_v2 = vadd.f32 %v3126_v37, %v1461_v61  ;;  %1594 = vmatpush.bf16.msrb.mxu3 %v1516_v51  ;;  %v2195_v15 = vpop.eup %2194  ;;  %2206 = vpow2.f32 %v1369_v0  ;;  %v1440_v16 = vrot.slane %v3133_v25, 4  ;;  %v1504_v13 = vpack.c.bf16 %v2193_v63, %v3152_v1 }
 0x4ec   : > { %v2197_v38 = vpop.eup %2196  ;;  %2208 = vpow2.f32 %v1373_v28 }
 0x4ed   : > { %1576 = vmatpush.bf16.msrb.mxu2 %v1498_v53  ;;  %v1463_v24 = vadd.f32 %v3152_v1, %v1462_v2  ;;  %v2199_v47 = vpop.eup %2198  ;;  %v1512_v3 = vpack.c.bf16 %v2197_v38, %v2195_v15  ;;  %v1441_v49 = vadd.f32 %v1440_v16, %v3133_v25  ;;  %v1502_v25 = vpack.c.bf16 %v3126_v37, %v3121_v8 }
 0x4ee   : > { %v2201_v48 = vpop.eup %2200  ;;  %v1213_v53 = vmul.f32 1.442695, %v1210_v26 }
 0x4ef   : > { %v1464_v62 = vadd.f32 %v2193_v63, %v1463_v24  ;;  %1595 = vmatpush.bf16.msrb.mxu3 %v1514_v40  ;;  %v2203_v4 = vpop.eup %2202  ;;  %v1506_v31 = vpack.c.bf16 %v2201_v48, %v2199_v47  ;;  %v1442_v51 = vrot.slane %v1441_v49, 2 }
 0x4f0   : > { %v2205_v34 = vpop.eup %2204 }
 0x4f1   : > { %1577 = vmatpush.bf16.msrb.mxu2 %v1496_v42  ;;  %v1465_v22 = vadd.f32 %v2199_v47, %v1464_v62  ;;  %v2207_v39 = vpop.eup %2206  ;;  %v1510_v57 = vpack.c.bf16 %v2205_v34, %v2203_v4  ;;  %v1443_v2 = vadd.f32 %v1442_v51, %v1441_v49 }
 0x4f2   : > { %v2209_v41 = vpop.eup %2208 }
 0x4f3   : > { %v1466_v60 = vadd.f32 %v2201_v48, %v1465_v22  ;;  %1596 = vmatpush.bf16.msrb.mxu3 %v1512_v3  ;;  %v1508_v18 = vpack.c.bf16 %v2209_v41, %v2207_v39 }
 0x4f5   : > { %1578 = vmatpush.bf16.msrb.mxu2 %v1494_v21  ;;  %v1467_v56 = vadd.f32 %v2207_v39, %v1466_v60 }
 0x4f7   : > { %v1468_v33 = vadd.f32 %v2209_v41, %v1467_v56  ;;  %1597 = vmatpush.bf16.msrb.mxu3 %v1510_v57 }
 0x4f8   : > { %1550 = vmatmul.bf16.gmra.mxu2 %v1965_v36 }
 0x4f9   : > { %1579 = vmatpush.bf16.msrb.mxu2 %v1492_v10  ;;  %v1469_v32 = vadd.f32 %v2203_v4, %v1468_v33 }
 0x4fa   : > { %1569 = vmatmul.bf16.gmra.mxu3 %v1969_v27 }
 0x4fb   : > { %v1470_v14 = vadd.f32 %v2205_v34, %v1469_v32  ;;  %1598 = vmatpush.bf16.msrb.mxu3 %v1508_v18 }
 0x4fd   : > { %1580 = vmatpush.bf16.msrb.mxu2 %v1490_v46  ;;  %v1471_v6 = vadd.f32 %v2195_v15, %v1470_v14 }
 0x4ff   : > { %v1472_v50 = vadd.f32 %v2197_v38, %v1471_v6  ;;  %1599 = vmatpush.bf16.msrb.mxu3 %v1506_v31  ;;  %v2006_v31 = vld [vmem:[%s3259_s6] sm:$0xff] }
 0x501   : > { %1581 = vmatpush.bf16.msrb.mxu2 %v1488_v17  ;;  %v1473_v29 = vadd.f32 %v3141_v52, %v1472_v50  ;;  %v1211_v52 = vmul.f32 1.442695, %v1209_v58 }
 0x503   : > { %v1474_v61 = vadd.f32 %v3146_v43, %v1473_v29  ;;  %1600 = vmatpush.bf16.msrb.mxu3 %v1504_v13  ;;  %2210 = vpow2.f32 %v1211_v52  ;;  %v1444_v43 = vrot.slane %v1443_v2, 1 }
 0x504   : > { %2212 = vpow2.f32 %v1213_v53 }
 0x505   : > { %1582 = vmatpush.bf16.msrb.mxu2 %v1486_v35  ;;  %v1475_v0 = vadd.f32 %v3130_v19, %v1474_v61  ;;  %v1445_v8 = vadd.f32 %v1444_v43, %v1443_v2  ;;  %v2007_v35 = vld [vmem:[%s3259_s6 + $0x8] sm:$0xff] }
 0x507   : > { %v1476_v1 = vadd.f32 %v3135_v12, %v1475_v0  ;;  %1601 = vmatpush.bf16.msrb.mxu3 %v1502_v25 }
 0x508   : > { %1583 = vmatmul.bf16.vlgmr.msrb.gmra.mxu2 %v3022_v44 }
 0x509   : > { %v1477_v63 = vrot.slane %v1476_v1, 4  ;;  %v2211_v19 = vpop.eup %2210 }
 0x50a   : > { %1602 = vmatmul.bf16.vlgmr.msrb.gmra.mxu3 %v3139_v59  ;;  %v2213_v24 = vpop.eup %2212  ;;  %v1407_v40 = vmul.f32 0.0, %v2211_v19 }
 0x50b   : > { %v1478_v23 = vadd.f32 %v1477_v63, %v1476_v1  ;;  %v1408_v12 = vmul.f32 0.0, %v2213_v24  ;;  %v1646_v1 = vpop.permute.xlu0 %1645  ;;  %v1719_v63 = vld [vmem:[%s2406_s23] sm:$0xff] }
 0x50c   : > { %v1483_v42 = vadd.f32 %v1445_v8, %v1407_v40 }
 0x50d   : > { %v1479_v28 = vrot.slane %v1478_v23, 2 }
 0x50e   : > { %2214 = vrcp.f32 %v1483_v42 }
 0x50f   : > { %v1480_v15 = vadd.f32 %v1479_v28, %v1478_v23  ;;  %v1651_v28 = vpop.permute.xlu2 %1650 }
 0x511   : > { %v1481_v37 = vrot.slane %v1480_v15, 1 }
 0x513   : > { %v1482_v38 = vadd.f32 %v1481_v37, %v1480_v15  ;;  %v1721_v15 = vld [vmem:[%s2406_s23 + $0x10] sm:$0xff]  ;;  %v1656_v37 = vpop.permute.xlu0 %1655 }
 0x514   : > { %v2215_v4 = vpop.eup %2214 }
 0x515   : > { %v1484_v47 = vadd.f32 %v1482_v38, %v1408_v12  ;;  %v1723_v38 = vld [vmem:[%s2406_s23 + $0x20] sm:$0xff] }
 0x517   : > { %2216 = vrcp.f32 %v1484_v47  ;;  %v1661_v47 = vpop.permute.xlu2 %1660 }
 0x518   : > { %1588 = vmatmul.bf16.gmra.mxu2 %v1965_v36 }
 0x51a   : > { %1607 = vmatmul.bf16.gmra.mxu3 %v1969_v27 }
 0x51d   : > { %v2217_v6 = vpop.eup %2216 }
 0x56b   : > { %v1546_v44 = vpop.f32.mrf.mxu2 }
 0x56d   : > { %v1565_v62 = vpop.f32.mrf.mxu3 }
 0x56e   : > { %v1566_v59 = vadd.f32 %v1565_v62, %v1546_v44  ;;  %v1725_v62 = vld [vmem:[%s2406_s23 + $0x30] sm:$0xff] }
 0x570   : > { %v1613_v48 = vadd.f32 %v1566_v59, %v1407_v40 }
 0x572   : > { %v1623_v22 = vmul.f32 %v2215_v4, %v1613_v48 }
 0x573   : > { %v1548_v3 = vpop.f32.mrf.mxu2 }
 0x575   : > { %v1567_v34 = vpop.f32.mrf.mxu3 }
 0x576   : > { %v1568_v21 = vadd.f32 %v1567_v34, %v1548_v3 }
 0x578   : > { %v1615_v60 = vadd.f32 %v1568_v21, %v1407_v40 }
 0x57a   : > { %v1625_v39 = vmul.f32 %v2215_v4, %v1615_v60  ;;  %v1722_v60 = vld [vmem:[%s2406_s23 + $0x18] sm:$0xff] }
 0x57b   : > { %v1551_v57 = vpop.f32.mrf.mxu2 }
 0x57c   : > { %v1631_v56 = vpack.c.bf16 %v1625_v39, %v1623_v22  ;;  %v1720_v22 = vld [vmem:[%s2406_s23 + $0x8] sm:$0xff] }
 0x57d   : > { %v1570_v7 = vpop.f32.mrf.mxu3 }
 0x57e   : > { %v1571_v20 = vadd.f32 %v1570_v7, %v1551_v57  ;;  %v1724_v7 = vld [vmem:[%s2406_s23 + $0x28] sm:$0xff] }
 0x580   : > { %v1617_v41 = vadd.f32 %v1571_v20, %v1407_v40 }
 0x582   : > { %v1627_v10 = vmul.f32 %v2215_v4, %v1617_v41 }
 0x583   : > { %v1553_v33 = vpop.f32.mrf.mxu2 }
 0x585   : > { %v1572_v11 = vpop.f32.mrf.mxu3 }
 0x586   : > { %v1573_v5 = vadd.f32 %v1572_v11, %v1553_v33  ;;  %v1726_v33 = vld [vmem:[%s2406_s23 + $0x38] sm:$0xff] }
 0x588   : > { %v1619_v36 = vadd.f32 %v1573_v5, %v1407_v40 }
 0x58a   : > { %v1629_v27 = vmul.f32 %v2215_v4, %v1619_v36 }
 0x58b   : > { %v1584_v18 = vpop.f32.mrf.mxu2 }
 0x58c   : > { %v1633_v32 = vpack.c.bf16 %v1629_v27, %v1627_v10 }
 0x58d   : > { %v1603_v46 = vpop.f32.mrf.mxu3 }
 0x58e   : > { %v1604_v14 = vadd.f32 %v1603_v46, %v1584_v18  ;;  %1685 = vmatpush.bf16.msra.mxu2 %v1633_v32 }
 0x590   : > { %v1614_v16 = vadd.f32 %v1604_v14, %v1408_v12 }
 0x592   : > { %v1624_v55 = vmul.f32 %v2217_v6, %v1614_v16  ;;  %1686 = vmatpush.bf16.msra.mxu2 %v1631_v56 }
 0x593   : > { %v1586_v54 = vpop.f32.mrf.mxu2 }
 0x595   : > { %v1605_v17 = vpop.f32.mrf.mxu3  ;;  %1978 = vmatmul.msk.bf16.vlgmr.msra.gmra.mxu2 %vm376_vm0, %v2006_v31 }
 0x596   : > { %v1606_v50 = vadd.f32 %v1605_v17, %v1586_v54 }
 0x598   : > { %v1616_v49 = vadd.f32 %v1606_v50, %v1408_v12 }
 0x59a   : > { %v1626_v29 = vmul.f32 %v2217_v6, %v1616_v49 }
 0x59b   : > { %v1589_v45 = vpop.f32.mrf.mxu2 }
 0x59c   : > { %v1632_v13 = vpack.c.bf16 %v1626_v29, %v1624_v55 }
 0x59d   : > { %v1608_v58 = vpop.f32.mrf.mxu3 }
 0x59e   : > { %v1609_v9 = vadd.f32 %v1608_v58, %v1589_v45 }
 0x5a0   : > { %v1618_v30 = vadd.f32 %v1609_v9, %v1408_v12 }
 0x5a2   : > { %v1628_v26 = vmul.f32 %v2217_v6, %v1618_v30 }
 0x5a3   : > { %v1591_v61 = vpop.f32.mrf.mxu2 }
 0x5a5   : > { %v1610_v51 = vpop.f32.mrf.mxu3  ;;  %1979 = vmatmul.msk.bf16.gmra.mxu2 %vm376_vm0, %v2007_v35 }
 0x5a6   : > { %v1611_v0 = vadd.f32 %v1610_v51, %v1591_v61 }
 0x5a8   : > { %v1620_v25 = vadd.f32 %v1611_v0, %v1408_v12 }
 0x5aa   : > { %v1630_v52 = vmul.f32 %v2217_v6, %v1620_v25 }
 0x5ac   : > { %v1634_v53 = vpack.c.bf16 %v1630_v52, %v1628_v26 }
 0x5ae   : > { %1704 = vmatpush.bf16.msra.mxu3 %v1634_v53 }
 0x5b2   : > { %1705 = vmatpush.bf16.msra.mxu3 %v1632_v13 }
 0x5b5   : > { %1980 = vmatmul.msk.bf16.vlgmr.msra.gmra.mxu3 %vm376_vm0, %v2006_v31 }
 0x5c5   : > { %1981 = vmatmul.msk.bf16.gmra.mxu3 %vm376_vm0, %v2007_v35 }
 0x618   : > { %v1688_v2 = vpop.f32.mrf.mxu2 }
 0x619   : > { %v1689_v23 = vadd.f32 %v1688_v2, %v1646_v1 }
 0x61b   : > { %v1727_v43 = vadd.f32 %v1719_v63, %v1689_v23 }
 0x61d   : > { %1735 = vst [vmem:[%s3197_s20] sm:$0xff] %v1727_v43 }
 0x620   : > { %v1690_v19 = vpop.f32.mrf.mxu2 }
 0x621   : > { %v1691_v24 = vadd.f32 %v1690_v19, %v1651_v28 }
 0x623   : > { %v1729_v8 = vadd.f32 %v1721_v15, %v1691_v24 }
 0x625   : > { %1737 = vst [vmem:[%s3197_s20 + $0x10] sm:$0xff] %v1729_v8 }
 0x628   : > { %v1693_v40 = vpop.f32.mrf.mxu2 }
 0x629   : > { %v1694_v12 = vadd.f32 %v1693_v40, %v1656_v37 }
 0x62b   : > { %v1731_v42 = vadd.f32 %v1723_v38, %v1694_v12 }
 0x62d   : > { %1739 = vst [vmem:[%s3197_s20 + $0x20] sm:$0xff] %v1731_v42 }
 0x630   : > { %v1695_v44 = vpop.f32.mrf.mxu2 }
 0x631   : > { %v1696_v59 = vadd.f32 %v1695_v44, %v1661_v47 }
 0x633   : > { %v1733_v48 = vadd.f32 %v1725_v62, %v1696_v59 }
 0x635   : > { %1741 = vst [vmem:[%s3197_s20 + $0x30] sm:$0xff] %v1733_v48 }
 0x638   : > { %v1707_v4 = vpop.f32.mrf.mxu3 }
 0x639   : > { %v1708_v3 = vadd.f32 %v1707_v4, %v1646_v1 }
 0x63b   : > { %v1728_v34 = vadd.f32 %v1720_v22, %v1708_v3 }
 0x63d   : > { %1736 = vst [vmem:[%s3197_s20 + $0x8] sm:$0xff] %v1728_v34 }
 0x640   : > { %v1709_v21 = vpop.f32.mrf.mxu3 }
 0x641   : > { %v1710_v39 = vadd.f32 %v1709_v21, %v1651_v28 }
 0x643   : > { %v1730_v56 = vadd.f32 %v1722_v60, %v1710_v39 }
 0x645   : > { %1738 = vst [vmem:[%s3197_s20 + $0x18] sm:$0xff] %v1730_v56 }
 0x648   : > { %v1712_v57 = vpop.f32.mrf.mxu3 }
 0x649   : > { %v1713_v20 = vadd.f32 %v1712_v57, %v1656_v37 }
 0x64b   : > { %v1732_v41 = vadd.f32 %v1724_v7, %v1713_v20 }
 0x64d   : > { %1740 = vst [vmem:[%s3197_s20 + $0x28] sm:$0xff] %v1732_v41 }
 0x650   : > { %v1714_v10 = vpop.f32.mrf.mxu3 }
 0x651   : > { %v1715_v11 = vadd.f32 %v1714_v10, %v1661_v47 }
 0x653   : > { %v1734_v5 = vadd.f32 %v1726_v33, %v1715_v11 }
 0x655   : > { %1742 = vst [vmem:[%s3197_s20 + $0x38] sm:$0xff] %v1734_v5 }
 0x656   : > { %2245 = shalt.err (!%p2242_p5)
}
 0x657   : > { %s2299_s16 = smov 256   ;;  %s2300_s20 = smov 16  }
 0x658   : > { %2013 = dma.vmem_to_hbm [thread:$0]  (%p2386_p4), %s1759_s26, 1024, %s1761_s11, %s1744_s12, %s2299_s16, %s2299_s16, %s2300_s20  }
 0x659 PF: > { %p2019_p6 = scmp.ge.s32.totalorder %s2296_s10, 2  ;;  %s1775_s25 = sand.u32 1, %s2276_s27  }
 0x65a   : > { %s1776_s19 = scalar_lea.sflag [#allocation6], %s1775_s25 }
 0x65b   : > { %p2016_p7 = pnand %p2019_p6, %p2393_p8 }
 0x65d   : > { %p2017_p9 = pneg %p2016_p7 }
 0x65f   : > { %2271 = dma.done.wait (%p2017_p9), %s1776_s19, 1024  }
 0x660   : > { %2273 = vsyncadd (%p2017_p9), %s1776_s19, 4294966272  ;;  %s21_s10 = sadd.s32 1, %s2296_s10   ;;  %s3327_s27 = smov %s2280_s28 }
 0x661   : > { %p18_p10 = scmp.ge.s32.totalorder %s21_s10, 4   ;;  %s3328_s28 = smov %s2284_s29 }
 0x662   : > { %s3329_s29 = smov %s2399_s18  ;;  %s3330_s30 = smov %s2292_s9 }
 0x663   : > { %s3331_s9 = smov %s3333_s13  ;;  %20 = sbr.rel (!%p18_p10) target bundleno = 4 (0x4), region = 93 }
 0x668   :  { %1782 = vsyncpa [#allocation6], 1 }
 0x669   :  { %1784 = vsyncpa [#allocation6 + $0x1], 1 }

</bundles_post_ra>
